<compile_context>
chip_gen: v7x
topology: tpu7x:2x2x1
jax: 0.10.0
libtpu: 0.0.40
codegen_flags: <defaults>
</compile_context>

<pallas_src>
import functools

import numpy as np
import jax
import jax.numpy as jnp
from jax.experimental import pallas as pl
from jax.experimental.pallas import tpu as pltpu


def scr_kernel(x_ref, w_in_ref, w1_ref, w2_ref, w_out_ref,
               b1_ref, b2_ref, b3_ref, b4_ref, out_ref, *, ksize, u, v):
    # x_ref block: (1, U*V, HWt, C0); channels on the lane dim.
    K, U, V = ksize, u, v
    HWt = x_ref.shape[2]
    U1, V1 = U - K + 1, V - K + 1              # spatial after conv1 (valid)

    # --- conv1x1_in (BN scale folded into w_in) + shift + ReLU ----------------
    # One (U*V*HWt, C0) x (C0, C1) matmul instead of U*V tiny per-(u,v) dots.
    x2d = jnp.concatenate([x_ref[0, p] for p in range(U * V)], axis=0)
    y1 = jnp.dot(x2d, w_in_ref[...], preferred_element_type=jnp.float32)
    y1 = jnp.maximum(y1 + b1_ref[...], 0.0).astype(x2d.dtype)   # (U*V*HWt, C1)

    # --- conv1: Conv3d (1,K,K) valid as im2col -> one matmul, K-dim = K*K*C1 --
    # Row block p = u_idx*V + v_idx holds the HWt rows of (u_idx, v_idx).
    slabs = []
    for ki in range(K):
        for kj in range(K):
            rows = [y1[((i + ki) * V + kj) * HWt:((i + ki) * V + kj + V1) * HWt, :]
                    for i in range(U1)]
            slabs.append(jnp.concatenate(rows, axis=0))
    col1 = jnp.concatenate(slabs, axis=1)                    # (U1*V1*HWt, K*K*C1)
    y2 = jnp.dot(col1, w1_ref[...], preferred_element_type=jnp.float32)
    y2 = jnp.maximum(y2 + b2_ref[...], 0.0).astype(x2d.dtype)   # (U1*V1*HWt, C2)

    # --- conv2: Conv3d (1,K,K) valid -> (u'',v'')=(1,1); im2col, K-dim K*K*C2 -
    slabs = [y2[(ki * V1 + kj) * HWt:(ki * V1 + kj + 1) * HWt, :]
             for ki in range(K) for kj in range(K)]
    col2 = jnp.concatenate(slabs, axis=1)                    # (HWt, K*K*C2)
    y3 = jnp.dot(col2, w2_ref[...], preferred_element_type=jnp.float32)
    y3 = jnp.maximum(y3 + b3_ref[...], 0.0).astype(x2d.dtype)   # (HWt, C3)

    # --- conv1x1_out (BN scale folded) + shift (no ReLU) ----------------------
    out = jnp.dot(y3, w_out_ref[...], preferred_element_type=jnp.float32)
    out = out + b4_ref[...]                                  # (HWt, C4)
    out_ref[0] = out.T.astype(out_ref.dtype)                 # lane-dense (C4, HWt)


def _pick_hw_tile(hw):
    # Tile HW only when it divides cleanly into lane-dense (multiple-of-128)
    # tiles; otherwise keep the whole HW extent in one block.
    for t in (512, 384, 256, 128):
        if hw % t == 0:
            return t
    return hw


def _fold_params(params, matmul_dtype):
    """Fold eval-mode BN scale into the conv weights; return matmul weights in
    `matmul_dtype` (im2col layout for the KxK convs) plus f32 shift rows."""
    w_in, w1, w2, w_out, bn1, bn2, bn3, bn4 = params
    K = w1.shape[0]
    c1, c2 = w_in.shape[1], w1.shape[3]
    c3, c4 = w2.shape[3], w_out.shape[1]
    w_in_f = (w_in * bn1[0][None, :]).astype(matmul_dtype)             # (C0, C1)
    w1_f = (w1 * bn2[0]).reshape(K * K * c1, c2).astype(matmul_dtype)  # (K*K*C1, C2)
    w2_f = (w2 * bn3[0]).reshape(K * K * c2, c3).astype(matmul_dtype)  # (K*K*C2, C3)
    w_out_f = (w_out * bn4[0][None, :]).astype(matmul_dtype)           # (C3, C4)
    b1 = bn1[1].reshape(1, c1).astype(jnp.float32)
    b2 = bn2[1].reshape(1, c2).astype(jnp.float32)
    b3 = bn3[1].reshape(1, c3).astype(jnp.float32)
    b4 = bn4[1].reshape(1, c4).astype(jnp.float32)
    return w_in_f, w1_f, w2_f, w_out_f, b1, b2, b3, b4


def scr_forward(x, params, *, matmul_dtype=jnp.bfloat16):
    """x: (b, c, h, w, u, v) float32 (PyTorch layout). Returns (b, c_out, h, w)."""
    w_in, w1, w2, w_out = params[:4]
    b, c0, h, w_, u, v = x.shape
    K = w1.shape[0]
    assert u - 2 * (K - 1) == 1 and v - 2 * (K - 1) == 1, (
        "the final view(b,c,h,w) requires the two (1,K,K) valid convs to "
        "reduce (u,v) to (1,1)")
    hw = h * w_
    c4 = w_out.shape[1]

    w_in_f, w1_f, w2_f, w_out_f, b1, b2, b3, b4 = _fold_params(params, matmul_dtype)

    # glue: channels-last kernel layout (B, U*V, HW, C0); matmul operands in
    # matmul_dtype (bf16 by default), accumulation stays f32 in-kernel.
    xk = jnp.transpose(x.reshape(b, c0, hw, u, v), (0, 3, 4, 2, 1))
    xk = xk.reshape(b, u * v, hw, c0).astype(matmul_dtype)

    hw_t = _pick_hw_tile(hw)
    grid = (b, hw // hw_t)
    kernel = functools.partial(scr_kernel, ksize=K, u=u, v=v)

    out = pl.pallas_call(
        kernel,
        out_shape=jax.ShapeDtypeStruct((b, c4, hw), jnp.float32),
        grid_spec=pltpu.PrefetchScalarGridSpec(
            num_scalar_prefetch=0,
            grid=grid,
            in_specs=[
                pl.BlockSpec((1, u * v, hw_t, c0), lambda i, t: (i, 0, t, 0)),
                pl.BlockSpec(w_in_f.shape, lambda i, t: (0, 0)),
                pl.BlockSpec(w1_f.shape, lambda i, t: (0, 0)),
                pl.BlockSpec(w2_f.shape, lambda i, t: (0, 0)),
                pl.BlockSpec(w_out_f.shape, lambda i, t: (0, 0)),
                pl.BlockSpec(b1.shape, lambda i, t: (0, 0)),
                pl.BlockSpec(b2.shape, lambda i, t: (0, 0)),
                pl.BlockSpec(b3.shape, lambda i, t: (0, 0)),
                pl.BlockSpec(b4.shape, lambda i, t: (0, 0)),
            ],
            out_specs=pl.BlockSpec((1, c4, hw_t), lambda i, t: (i, 0, t)),
        ),
        compiler_params=pltpu.CompilerParams(
            dimension_semantics=("parallel", "parallel")),
    )(xk, w_in_f, w1_f, w2_f, w_out_f, b1, b2, b3, b4)

    # glue: (b, c4, hw) is already channel-major -> plain reshape, no transpose.
    return out.reshape(b, c4, h, w_)


def make_params(key, planes=(32, 16, 16, 16, 32), ksize=3, eps=1e-5):
    """Deterministic synthetic parameters (conv weights + eval-mode BN folded
    into per-channel scale/shift stacked as (2, C))."""
    c0, c1, c2, c3, c4 = planes
    keys = jax.random.split(key, 20)

    def conv_w(k, shape, fan_in):
        bound = float(fan_in) ** -0.5
        return jax.random.uniform(k, shape, jnp.float32, -bound, bound)

    w_in = conv_w(keys[0], (c0, c1), c0)                              # Conv2d 1x1
    w1 = conv_w(keys[1], (ksize, ksize, c1, c2), c1 * ksize * ksize)  # Conv3d (1,k,k)
    w2 = conv_w(keys[2], (ksize, ksize, c2, c3), c2 * ksize * ksize)  # Conv3d (1,k,k)
    w_out = conv_w(keys[3], (c3, c4), c3)                             # Conv2d 1x1

    def bn(kg, kb, km, kv, c):
        gamma = jax.random.uniform(kg, (c,), jnp.float32, 0.5, 1.5)
        beta = jax.random.uniform(kb, (c,), jnp.float32, -0.1, 0.1)
        mean = jax.random.uniform(km, (c,), jnp.float32, -0.1, 0.1)
        var = jax.random.uniform(kv, (c,), jnp.float32, 0.5, 1.5)
        scale = gamma / jnp.sqrt(var + eps)
        shift = beta - mean * scale
        return jnp.stack([scale, shift], axis=0)                      # (2, C)

    bn1 = bn(keys[4], keys[5], keys[6], keys[7], c1)
    bn2 = bn(keys[8], keys[9], keys[10], keys[11], c2)
    bn3 = bn(keys[12], keys[13], keys[14], keys[15], c3)
    bn4 = bn(keys[16], keys[17], keys[18], keys[19], c4)
    return (w_in, w1, w2, w_out, bn1, bn2, bn3, bn4)


def scr_reference(x, params):
    """Pure-JAX f32 reference implementing the same forward pass."""
    w_in, w1, w2, w_out, bn1, bn2, bn3, bn4 = params
    b, c, h, w, u, v = x.shape
    K = w1.shape[0]
    xk = jnp.transpose(x.reshape(b, c, h * w, u, v), (0, 2, 3, 4, 1))
    y = jnp.einsum('bduvc,ck->bduvk', xk, w_in)
    y = jnp.maximum(y * bn1[0] + bn1[1], 0.0)
    u1, v1 = u - K + 1, v - K + 1
    z = jnp.zeros(y.shape[:2] + (u1, v1, w1.shape[3]), jnp.float32)
    for ki in range(K):
        for kj in range(K):
            z = z + jnp.einsum('bduvc,ck->bduvk',
                               y[:, :, ki:ki + u1, kj:kj + v1, :], w1[ki, kj])
    z = jnp.maximum(z * bn2[0] + bn2[1], 0.0)
    u2, v2 = u1 - K + 1, v1 - K + 1
    q = jnp.zeros(z.shape[:2] + (u2, v2, w2.shape[3]), jnp.float32)
    for ki in range(K):
        for kj in range(K):
            q = q + jnp.einsum('bduvc,ck->bduvk',
                               z[:, :, ki:ki + u2, kj:kj + v2, :], w2[ki, kj])
    q = jnp.maximum(q * bn3[0] + bn3[1], 0.0)
    q = q[:, :, 0, 0, :]                                              # (b, hw, c3)
    o = jnp.einsum('bdc,ck->bdk', q, w_out) * bn4[0] + bn4[1]
    return jnp.transpose(o, (0, 2, 1)).reshape(b, w_out.shape[1], h, w)


if __name__ == "__main__":
    key = jax.random.PRNGKey(0)
    kx, kp = jax.random.split(key)

    planes = (32, 16, 16, 16, 32)   # small synthetic [c0, c1, c2, c3, c4]
    b, h, w, u, v = 2, 4, 4, 5, 5   # (u, v) = 5 so two valid 3x3 convs -> 1x1

    x = jax.random.normal(kx, (b, planes[0], h, w, u, v), dtype=jnp.float32)
    params = make_params(kp, planes=planes, ksize=3)

    ref = scr_reference(x, params)

    # f32 kernel path: verifies the restructured kernel exactly.
    out_f32 = jax.block_until_ready(scr_forward(x, params, matmul_dtype=jnp.float32))
    assert out_f32.shape == (b, planes[4], h, w)
    np.testing.assert_allclose(np.asarray(out_f32), np.asarray(ref),
                               rtol=2e-4, atol=2e-4)

    # bf16 (default, performance) path: loose tolerance covers bf16 matmul
    # operand quantization (accumulation stays f32).
    out = jax.block_until_ready(scr_forward(x, params))
    assert out.shape == (b, planes[4], h, w)
    np.testing.assert_allclose(np.asarray(out), np.asarray(ref),
                               rtol=5e-2, atol=5e-2)

    print("KERNEL_OK")
</pallas_src>

<mosaic_0001>
module attributes {stable_mosaic.version = 11 : i64} {
  func.func @scr_kernel(%arg0: i32, %arg1: i32, %arg2: memref<1x25x16x32xf32, #tpu.memory_space<vmem>>, %arg3: memref<32x16xf32, #tpu.memory_space<vmem>>, %arg4: memref<144x16xf32, #tpu.memory_space<vmem>>, %arg5: memref<144x16xf32, #tpu.memory_space<vmem>>, %arg6: memref<16x32xf32, #tpu.memory_space<vmem>>, %arg7: memref<1x16xf32, #tpu.memory_space<vmem>>, %arg8: memref<1x16xf32, #tpu.memory_space<vmem>>, %arg9: memref<1x16xf32, #tpu.memory_space<vmem>>, %arg10: memref<1x32xf32, #tpu.memory_space<vmem>>, %arg11: memref<1x32x16xf32, #tpu.memory_space<vmem>>) attributes {dimension_semantics = [#tpu.dimension_semantics<parallel>, #tpu.dimension_semantics<parallel>], iteration_bounds = array<i64: 2, 1>, scalar_prefetch = 0 : i64, scratch_operands = 0 : i64, tpu.core_type = #tpu.core_type<tc>, window_params = [{transform_indices = @transform_0, window_bounds = array<i64: 1, 25, 16, 32>}, {pipeline_mode = #tpu.pipeline_mode<synchronous>, transform_indices = @transform_1, window_bounds = array<i64: 32, 16>}, {pipeline_mode = #tpu.pipeline_mode<synchronous>, transform_indices = @transform_2, window_bounds = array<i64: 144, 16>}, {pipeline_mode = #tpu.pipeline_mode<synchronous>, transform_indices = @transform_3, window_bounds = array<i64: 144, 16>}, {pipeline_mode = #tpu.pipeline_mode<synchronous>, transform_indices = @transform_4, window_bounds = array<i64: 16, 32>}, {pipeline_mode = #tpu.pipeline_mode<synchronous>, transform_indices = @transform_5, window_bounds = array<i64: 1, 16>}, {pipeline_mode = #tpu.pipeline_mode<synchronous>, transform_indices = @transform_6, window_bounds = array<i64: 1, 16>}, {pipeline_mode = #tpu.pipeline_mode<synchronous>, transform_indices = @transform_7, window_bounds = array<i64: 1, 16>}, {pipeline_mode = #tpu.pipeline_mode<synchronous>, transform_indices = @transform_8, window_bounds = array<i64: 1, 32>}, {transform_indices = @transform_9, window_bounds = array<i64: 1, 32, 16>}]} {
    %c0 = arith.constant 0 : index
    %c0_0 = arith.constant 0 : index
    %c0_1 = arith.constant 0 : index
    %c0_2 = arith.constant 0 : index
    %0 = vector.load %arg2[%c0, %c0_0, %c0_1, %c0_2] : memref<1x25x16x32xf32, #tpu.memory_space<vmem>>, vector<1x1x16x32xf32>
    %1 = vector.shape_cast %0 : vector<1x1x16x32xf32> to vector<16x32xf32>
    %c0_3 = arith.constant 0 : index
    %c1 = arith.constant 1 : index
    %c0_4 = arith.constant 0 : index
    %c0_5 = arith.constant 0 : index
    %2 = vector.load %arg2[%c0_3, %c1, %c0_4, %c0_5] : memref<1x25x16x32xf32, #tpu.memory_space<vmem>>, vector<1x1x16x32xf32>
    %3 = vector.shape_cast %2 : vector<1x1x16x32xf32> to vector<16x32xf32>
    %c0_6 = arith.constant 0 : index
    %c2 = arith.constant 2 : index
    %c0_7 = arith.constant 0 : index
    %c0_8 = arith.constant 0 : index
    %4 = vector.load %arg2[%c0_6, %c2, %c0_7, %c0_8] : memref<1x25x16x32xf32, #tpu.memory_space<vmem>>, vector<1x1x16x32xf32>
    %5 = vector.shape_cast %4 : vector<1x1x16x32xf32> to vector<16x32xf32>
    %c0_9 = arith.constant 0 : index
    %c3 = arith.constant 3 : index
    %c0_10 = arith.constant 0 : index
    %c0_11 = arith.constant 0 : index
    %6 = vector.load %arg2[%c0_9, %c3, %c0_10, %c0_11] : memref<1x25x16x32xf32, #tpu.memory_space<vmem>>, vector<1x1x16x32xf32>
    %7 = vector.shape_cast %6 : vector<1x1x16x32xf32> to vector<16x32xf32>
    %c0_12 = arith.constant 0 : index
    %c4 = arith.constant 4 : index
    %c0_13 = arith.constant 0 : index
    %c0_14 = arith.constant 0 : index
    %8 = vector.load %arg2[%c0_12, %c4, %c0_13, %c0_14] : memref<1x25x16x32xf32, #tpu.memory_space<vmem>>, vector<1x1x16x32xf32>
    %9 = vector.shape_cast %8 : vector<1x1x16x32xf32> to vector<16x32xf32>
    %c0_15 = arith.constant 0 : index
    %c5 = arith.constant 5 : index
    %c0_16 = arith.constant 0 : index
    %c0_17 = arith.constant 0 : index
    %10 = vector.load %arg2[%c0_15, %c5, %c0_16, %c0_17] : memref<1x25x16x32xf32, #tpu.memory_space<vmem>>, vector<1x1x16x32xf32>
    %11 = vector.shape_cast %10 : vector<1x1x16x32xf32> to vector<16x32xf32>
    %c0_18 = arith.constant 0 : index
    %c6 = arith.constant 6 : index
    %c0_19 = arith.constant 0 : index
    %c0_20 = arith.constant 0 : index
    %12 = vector.load %arg2[%c0_18, %c6, %c0_19, %c0_20] : memref<1x25x16x32xf32, #tpu.memory_space<vmem>>, vector<1x1x16x32xf32>
    %13 = vector.shape_cast %12 : vector<1x1x16x32xf32> to vector<16x32xf32>
    %c0_21 = arith.constant 0 : index
    %c7 = arith.constant 7 : index
    %c0_22 = arith.constant 0 : index
    %c0_23 = arith.constant 0 : index
    %14 = vector.load %arg2[%c0_21, %c7, %c0_22, %c0_23] : memref<1x25x16x32xf32, #tpu.memory_space<vmem>>, vector<1x1x16x32xf32>
    %15 = vector.shape_cast %14 : vector<1x1x16x32xf32> to vector<16x32xf32>
    %c0_24 = arith.constant 0 : index
    %c8 = arith.constant 8 : index
    %c0_25 = arith.constant 0 : index
    %c0_26 = arith.constant 0 : index
    %16 = vector.load %arg2[%c0_24, %c8, %c0_25, %c0_26] : memref<1x25x16x32xf32, #tpu.memory_space<vmem>>, vector<1x1x16x32xf32>
    %17 = vector.shape_cast %16 : vector<1x1x16x32xf32> to vector<16x32xf32>
    %c0_27 = arith.constant 0 : index
    %c9 = arith.constant 9 : index
    %c0_28 = arith.constant 0 : index
    %c0_29 = arith.constant 0 : index
    %18 = vector.load %arg2[%c0_27, %c9, %c0_28, %c0_29] : memref<1x25x16x32xf32, #tpu.memory_space<vmem>>, vector<1x1x16x32xf32>
    %19 = vector.shape_cast %18 : vector<1x1x16x32xf32> to vector<16x32xf32>
    %c0_30 = arith.constant 0 : index
    %c10 = arith.constant 10 : index
    %c0_31 = arith.constant 0 : index
    %c0_32 = arith.constant 0 : index
    %20 = vector.load %arg2[%c0_30, %c10, %c0_31, %c0_32] : memref<1x25x16x32xf32, #tpu.memory_space<vmem>>, vector<1x1x16x32xf32>
    %21 = vector.shape_cast %20 : vector<1x1x16x32xf32> to vector<16x32xf32>
    %c0_33 = arith.constant 0 : index
    %c11 = arith.constant 11 : index
    %c0_34 = arith.constant 0 : index
    %c0_35 = arith.constant 0 : index
    %22 = vector.load %arg2[%c0_33, %c11, %c0_34, %c0_35] : memref<1x25x16x32xf32, #tpu.memory_space<vmem>>, vector<1x1x16x32xf32>
    %23 = vector.shape_cast %22 : vector<1x1x16x32xf32> to vector<16x32xf32>
    %c0_36 = arith.constant 0 : index
    %c12 = arith.constant 12 : index
    %c0_37 = arith.constant 0 : index
    %c0_38 = arith.constant 0 : index
    %24 = vector.load %arg2[%c0_36, %c12, %c0_37, %c0_38] : memref<1x25x16x32xf32, #tpu.memory_space<vmem>>, vector<1x1x16x32xf32>
    %25 = vector.shape_cast %24 : vector<1x1x16x32xf32> to vector<16x32xf32>
    %c0_39 = arith.constant 0 : index
    %c13 = arith.constant 13 : index
    %c0_40 = arith.constant 0 : index
    %c0_41 = arith.constant 0 : index
    %26 = vector.load %arg2[%c0_39, %c13, %c0_40, %c0_41] : memref<1x25x16x32xf32, #tpu.memory_space<vmem>>, vector<1x1x16x32xf32>
    %27 = vector.shape_cast %26 : vector<1x1x16x32xf32> to vector<16x32xf32>
    %c0_42 = arith.constant 0 : index
    %c14 = arith.constant 14 : index
    %c0_43 = arith.constant 0 : index
    %c0_44 = arith.constant 0 : index
    %28 = vector.load %arg2[%c0_42, %c14, %c0_43, %c0_44] : memref<1x25x16x32xf32, #tpu.memory_space<vmem>>, vector<1x1x16x32xf32>
    %29 = vector.shape_cast %28 : vector<1x1x16x32xf32> to vector<16x32xf32>
    %c0_45 = arith.constant 0 : index
    %c15 = arith.constant 15 : index
    %c0_46 = arith.constant 0 : index
    %c0_47 = arith.constant 0 : index
    %30 = vector.load %arg2[%c0_45, %c15, %c0_46, %c0_47] : memref<1x25x16x32xf32, #tpu.memory_space<vmem>>, vector<1x1x16x32xf32>
    %31 = vector.shape_cast %30 : vector<1x1x16x32xf32> to vector<16x32xf32>
    %c0_48 = arith.constant 0 : index
    %c16 = arith.constant 16 : index
    %c0_49 = arith.constant 0 : index
    %c0_50 = arith.constant 0 : index
    %32 = vector.load %arg2[%c0_48, %c16, %c0_49, %c0_50] : memref<1x25x16x32xf32, #tpu.memory_space<vmem>>, vector<1x1x16x32xf32>
    %33 = vector.shape_cast %32 : vector<1x1x16x32xf32> to vector<16x32xf32>
    %c0_51 = arith.constant 0 : index
    %c17 = arith.constant 17 : index
    %c0_52 = arith.constant 0 : index
    %c0_53 = arith.constant 0 : index
    %34 = vector.load %arg2[%c0_51, %c17, %c0_52, %c0_53] : memref<1x25x16x32xf32, #tpu.memory_space<vmem>>, vector<1x1x16x32xf32>
    %35 = vector.shape_cast %34 : vector<1x1x16x32xf32> to vector<16x32xf32>
    %c0_54 = arith.constant 0 : index
    %c18 = arith.constant 18 : index
    %c0_55 = arith.constant 0 : index
    %c0_56 = arith.constant 0 : index
    %36 = vector.load %arg2[%c0_54, %c18, %c0_55, %c0_56] : memref<1x25x16x32xf32, #tpu.memory_space<vmem>>, vector<1x1x16x32xf32>
    %37 = vector.shape_cast %36 : vector<1x1x16x32xf32> to vector<16x32xf32>
    %c0_57 = arith.constant 0 : index
    %c19 = arith.constant 19 : index
    %c0_58 = arith.constant 0 : index
    %c0_59 = arith.constant 0 : index
    %38 = vector.load %arg2[%c0_57, %c19, %c0_58, %c0_59] : memref<1x25x16x32xf32, #tpu.memory_space<vmem>>, vector<1x1x16x32xf32>
    %39 = vector.shape_cast %38 : vector<1x1x16x32xf32> to vector<16x32xf32>
    %c0_60 = arith.constant 0 : index
    %c20 = arith.constant 20 : index
    %c0_61 = arith.constant 0 : index
    %c0_62 = arith.constant 0 : index
    %40 = vector.load %arg2[%c0_60, %c20, %c0_61, %c0_62] : memref<1x25x16x32xf32, #tpu.memory_space<vmem>>, vector<1x1x16x32xf32>
    %41 = vector.shape_cast %40 : vector<1x1x16x32xf32> to vector<16x32xf32>
    %c0_63 = arith.constant 0 : index
    %c21 = arith.constant 21 : index
    %c0_64 = arith.constant 0 : index
    %c0_65 = arith.constant 0 : index
    %42 = vector.load %arg2[%c0_63, %c21, %c0_64, %c0_65] : memref<1x25x16x32xf32, #tpu.memory_space<vmem>>, vector<1x1x16x32xf32>
    %43 = vector.shape_cast %42 : vector<1x1x16x32xf32> to vector<16x32xf32>
    %c0_66 = arith.constant 0 : index
    %c22 = arith.constant 22 : index
    %c0_67 = arith.constant 0 : index
    %c0_68 = arith.constant 0 : index
    %44 = vector.load %arg2[%c0_66, %c22, %c0_67, %c0_68] : memref<1x25x16x32xf32, #tpu.memory_space<vmem>>, vector<1x1x16x32xf32>
    %45 = vector.shape_cast %44 : vector<1x1x16x32xf32> to vector<16x32xf32>
    %c0_69 = arith.constant 0 : index
    %c23 = arith.constant 23 : index
    %c0_70 = arith.constant 0 : index
    %c0_71 = arith.constant 0 : index
    %46 = vector.load %arg2[%c0_69, %c23, %c0_70, %c0_71] : memref<1x25x16x32xf32, #tpu.memory_space<vmem>>, vector<1x1x16x32xf32>
    %47 = vector.shape_cast %46 : vector<1x1x16x32xf32> to vector<16x32xf32>
    %c0_72 = arith.constant 0 : index
    %c24 = arith.constant 24 : index
    %c0_73 = arith.constant 0 : index
    %c0_74 = arith.constant 0 : index
    %48 = vector.load %arg2[%c0_72, %c24, %c0_73, %c0_74] : memref<1x25x16x32xf32, #tpu.memory_space<vmem>>, vector<1x1x16x32xf32>
    %49 = vector.shape_cast %48 : vector<1x1x16x32xf32> to vector<16x32xf32>
    %50 = tpu.concatenate %1, %3, %5, %7, %9, %11, %13, %15, %17, %19, %21, %23, %25, %27, %29, %31 in 0 : vector<16x32xf32>, vector<16x32xf32>, vector<16x32xf32>, vector<16x32xf32>, vector<16x32xf32>, vector<16x32xf32>, vector<16x32xf32>, vector<16x32xf32>, vector<16x32xf32>, vector<16x32xf32>, vector<16x32xf32>, vector<16x32xf32>, vector<16x32xf32>, vector<16x32xf32>, vector<16x32xf32>, vector<16x32xf32> -> vector<256x32xf32>
    %51 = tpu.concatenate %33, %35, %37, %39, %41, %43, %45, %47, %49 in 0 : vector<16x32xf32>, vector<16x32xf32>, vector<16x32xf32>, vector<16x32xf32>, vector<16x32xf32>, vector<16x32xf32>, vector<16x32xf32>, vector<16x32xf32>, vector<16x32xf32> -> vector<144x32xf32>
    %52 = tpu.concatenate %50, %51 in 0 : vector<256x32xf32>, vector<144x32xf32> -> vector<400x32xf32>
    %c0_75 = arith.constant 0 : index
    %c0_76 = arith.constant 0 : index
    %53 = vector.load %arg3[%c0_75, %c0_76] : memref<32x16xf32, #tpu.memory_space<vmem>>, vector<32x16xf32>
    %cst = arith.constant dense<0.000000e+00> : vector<400x16xf32>
    %54 = tpu.matmul %52, %53, %cst {dimension_numbers = #tpu.dot_dimension_numbers<[1], [0], [0], [1], [0, 0, 1, 1], [], []>} : vector<400x32xf32>, vector<32x16xf32>, vector<400x16xf32> -> vector<400x16xf32>
    %c0_77 = arith.constant 0 : index
    %c0_78 = arith.constant 0 : index
    %55 = vector.load %arg7[%c0_77, %c0_78] : memref<1x16xf32, #tpu.memory_space<vmem>>, vector<1x16xf32>
    %56 = vector.broadcast %55 : vector<1x16xf32> to vector<400x16xf32>
    %57 = arith.addf %54, %56 : vector<400x16xf32>
    %cst_79 = arith.constant 0.000000e+00 : f32
    %58 = vector.broadcast %cst_79 : f32 to vector<400x16xf32>
    %59 = arith.maximumf %57, %58 : vector<400x16xf32>
    %60 = vector.extract_strided_slice %59 {offsets = [0, 0], sizes = [48, 16], strides = [1, 1]} : vector<400x16xf32> to vector<48x16xf32>
    %61 = vector.extract_strided_slice %59 {offsets = [80, 0], sizes = [48, 16], strides = [1, 1]} : vector<400x16xf32> to vector<48x16xf32>
    %62 = vector.extract_strided_slice %59 {offsets = [160, 0], sizes = [48, 16], strides = [1, 1]} : vector<400x16xf32> to vector<48x16xf32>
    %63 = tpu.concatenate %60, %61, %62 in 0 : vector<48x16xf32>, vector<48x16xf32>, vector<48x16xf32> -> vector<144x16xf32>
    %64 = vector.extract_strided_slice %59 {offsets = [16, 0], sizes = [48, 16], strides = [1, 1]} : vector<400x16xf32> to vector<48x16xf32>
    %65 = vector.extract_strided_slice %59 {offsets = [96, 0], sizes = [48, 16], strides = [1, 1]} : vector<400x16xf32> to vector<48x16xf32>
    %66 = vector.extract_strided_slice %59 {offsets = [176, 0], sizes = [48, 16], strides = [1, 1]} : vector<400x16xf32> to vector<48x16xf32>
    %67 = tpu.concatenate %64, %65, %66 in 0 : vector<48x16xf32>, vector<48x16xf32>, vector<48x16xf32> -> vector<144x16xf32>
    %68 = vector.extract_strided_slice %59 {offsets = [32, 0], sizes = [48, 16], strides = [1, 1]} : vector<400x16xf32> to vector<48x16xf32>
    %69 = vector.extract_strided_slice %59 {offsets = [112, 0], sizes = [48, 16], strides = [1, 1]} : vector<400x16xf32> to vector<48x16xf32>
    %70 = vector.extract_strided_slice %59 {offsets = [192, 0], sizes = [48, 16], strides = [1, 1]} : vector<400x16xf32> to vector<48x16xf32>
    %71 = tpu.concatenate %68, %69, %70 in 0 : vector<48x16xf32>, vector<48x16xf32>, vector<48x16xf32> -> vector<144x16xf32>
    %72 = vector.extract_strided_slice %59 {offsets = [80, 0], sizes = [48, 16], strides = [1, 1]} : vector<400x16xf32> to vector<48x16xf32>
    %73 = vector.extract_strided_slice %59 {offsets = [160, 0], sizes = [48, 16], strides = [1, 1]} : vector<400x16xf32> to vector<48x16xf32>
    %74 = vector.extract_strided_slice %59 {offsets = [240, 0], sizes = [48, 16], strides = [1, 1]} : vector<400x16xf32> to vector<48x16xf32>
    %75 = tpu.concatenate %72, %73, %74 in 0 : vector<48x16xf32>, vector<48x16xf32>, vector<48x16xf32> -> vector<144x16xf32>
    %76 = vector.extract_strided_slice %59 {offsets = [96, 0], sizes = [48, 16], strides = [1, 1]} : vector<400x16xf32> to vector<48x16xf32>
    %77 = vector.extract_strided_slice %59 {offsets = [176, 0], sizes = [48, 16], strides = [1, 1]} : vector<400x16xf32> to vector<48x16xf32>
    %78 = vector.extract_strided_slice %59 {offsets = [256, 0], sizes = [48, 16], strides = [1, 1]} : vector<400x16xf32> to vector<48x16xf32>
    %79 = tpu.concatenate %76, %77, %78 in 0 : vector<48x16xf32>, vector<48x16xf32>, vector<48x16xf32> -> vector<144x16xf32>
    %80 = vector.extract_strided_slice %59 {offsets = [112, 0], sizes = [48, 16], strides = [1, 1]} : vector<400x16xf32> to vector<48x16xf32>
    %81 = vector.extract_strided_slice %59 {offsets = [192, 0], sizes = [48, 16], strides = [1, 1]} : vector<400x16xf32> to vector<48x16xf32>
    %82 = vector.extract_strided_slice %59 {offsets = [272, 0], sizes = [48, 16], strides = [1, 1]} : vector<400x16xf32> to vector<48x16xf32>
    %83 = tpu.concatenate %80, %81, %82 in 0 : vector<48x16xf32>, vector<48x16xf32>, vector<48x16xf32> -> vector<144x16xf32>
    %84 = vector.extract_strided_slice %59 {offsets = [160, 0], sizes = [48, 16], strides = [1, 1]} : vector<400x16xf32> to vector<48x16xf32>
    %85 = vector.extract_strided_slice %59 {offsets = [240, 0], sizes = [48, 16], strides = [1, 1]} : vector<400x16xf32> to vector<48x16xf32>
    %86 = vector.extract_strided_slice %59 {offsets = [320, 0], sizes = [48, 16], strides = [1, 1]} : vector<400x16xf32> to vector<48x16xf32>
    %87 = tpu.concatenate %84, %85, %86 in 0 : vector<48x16xf32>, vector<48x16xf32>, vector<48x16xf32> -> vector<144x16xf32>
    %88 = vector.extract_strided_slice %59 {offsets = [176, 0], sizes = [48, 16], strides = [1, 1]} : vector<400x16xf32> to vector<48x16xf32>
    %89 = vector.extract_strided_slice %59 {offsets = [256, 0], sizes = [48, 16], strides = [1, 1]} : vector<400x16xf32> to vector<48x16xf32>
    %90 = vector.extract_strided_slice %59 {offsets = [336, 0], sizes = [48, 16], strides = [1, 1]} : vector<400x16xf32> to vector<48x16xf32>
    %91 = tpu.concatenate %88, %89, %90 in 0 : vector<48x16xf32>, vector<48x16xf32>, vector<48x16xf32> -> vector<144x16xf32>
    %92 = vector.extract_strided_slice %59 {offsets = [192, 0], sizes = [48, 16], strides = [1, 1]} : vector<400x16xf32> to vector<48x16xf32>
    %93 = vector.extract_strided_slice %59 {offsets = [272, 0], sizes = [48, 16], strides = [1, 1]} : vector<400x16xf32> to vector<48x16xf32>
    %94 = vector.extract_strided_slice %59 {offsets = [352, 0], sizes = [48, 16], strides = [1, 1]} : vector<400x16xf32> to vector<48x16xf32>
    %95 = tpu.concatenate %92, %93, %94 in 0 : vector<48x16xf32>, vector<48x16xf32>, vector<48x16xf32> -> vector<144x16xf32>
    %96 = tpu.concatenate %63, %67, %71, %75, %79, %83, %87, %91, %95 in 1 : vector<144x16xf32>, vector<144x16xf32>, vector<144x16xf32>, vector<144x16xf32>, vector<144x16xf32>, vector<144x16xf32>, vector<144x16xf32>, vector<144x16xf32>, vector<144x16xf32> -> vector<144x144xf32>
    %c0_80 = arith.constant 0 : index
    %c0_81 = arith.constant 0 : index
    %97 = vector.load %arg4[%c0_80, %c0_81] : memref<144x16xf32, #tpu.memory_space<vmem>>, vector<144x16xf32>
    %cst_82 = arith.constant dense<0.000000e+00> : vector<144x16xf32>
    %98 = tpu.matmul %96, %97, %cst_82 {dimension_numbers = #tpu.dot_dimension_numbers<[1], [0], [0], [1], [0, 0, 1, 1], [], []>} : vector<144x144xf32>, vector<144x16xf32>, vector<144x16xf32> -> vector<144x16xf32>
    %c0_83 = arith.constant 0 : index
    %c0_84 = arith.constant 0 : index
    %99 = vector.load %arg8[%c0_83, %c0_84] : memref<1x16xf32, #tpu.memory_space<vmem>>, vector<1x16xf32>
    %100 = vector.broadcast %99 : vector<1x16xf32> to vector<144x16xf32>
    %101 = arith.addf %98, %100 : vector<144x16xf32>
    %cst_85 = arith.constant 0.000000e+00 : f32
    %102 = vector.broadcast %cst_85 : f32 to vector<144x16xf32>
    %103 = arith.maximumf %101, %102 : vector<144x16xf32>
    %104 = vector.extract_strided_slice %103 {offsets = [0, 0], sizes = [16, 16], strides = [1, 1]} : vector<144x16xf32> to vector<16x16xf32>
    %105 = vector.extract_strided_slice %103 {offsets = [16, 0], sizes = [16, 16], strides = [1, 1]} : vector<144x16xf32> to vector<16x16xf32>
    %106 = vector.extract_strided_slice %103 {offsets = [32, 0], sizes = [16, 16], strides = [1, 1]} : vector<144x16xf32> to vector<16x16xf32>
    %107 = vector.extract_strided_slice %103 {offsets = [48, 0], sizes = [16, 16], strides = [1, 1]} : vector<144x16xf32> to vector<16x16xf32>
    %108 = vector.extract_strided_slice %103 {offsets = [64, 0], sizes = [16, 16], strides = [1, 1]} : vector<144x16xf32> to vector<16x16xf32>
    %109 = vector.extract_strided_slice %103 {offsets = [80, 0], sizes = [16, 16], strides = [1, 1]} : vector<144x16xf32> to vector<16x16xf32>
    %110 = vector.extract_strided_slice %103 {offsets = [96, 0], sizes = [16, 16], strides = [1, 1]} : vector<144x16xf32> to vector<16x16xf32>
    %111 = vector.extract_strided_slice %103 {offsets = [112, 0], sizes = [16, 16], strides = [1, 1]} : vector<144x16xf32> to vector<16x16xf32>
    %112 = vector.extract_strided_slice %103 {offsets = [128, 0], sizes = [16, 16], strides = [1, 1]} : vector<144x16xf32> to vector<16x16xf32>
    %113 = tpu.concatenate %104, %105, %106, %107, %108, %109, %110, %111, %112 in 1 : vector<16x16xf32>, vector<16x16xf32>, vector<16x16xf32>, vector<16x16xf32>, vector<16x16xf32>, vector<16x16xf32>, vector<16x16xf32>, vector<16x16xf32>, vector<16x16xf32> -> vector<16x144xf32>
    %c0_86 = arith.constant 0 : index
    %c0_87 = arith.constant 0 : index
    %114 = vector.load %arg5[%c0_86, %c0_87] : memref<144x16xf32, #tpu.memory_space<vmem>>, vector<144x16xf32>
    %cst_88 = arith.constant dense<0.000000e+00> : vector<16x16xf32>
    %115 = tpu.matmul %113, %114, %cst_88 {dimension_numbers = #tpu.dot_dimension_numbers<[1], [0], [0], [1], [0, 0, 1, 1], [], []>} : vector<16x144xf32>, vector<144x16xf32>, vector<16x16xf32> -> vector<16x16xf32>
    %c0_89 = arith.constant 0 : index
    %c0_90 = arith.constant 0 : index
    %116 = vector.load %arg9[%c0_89, %c0_90] : memref<1x16xf32, #tpu.memory_space<vmem>>, vector<1x16xf32>
    %117 = vector.broadcast %116 : vector<1x16xf32> to vector<16x16xf32>
    %118 = arith.addf %115, %117 : vector<16x16xf32>
    %cst_91 = arith.constant 0.000000e+00 : f32
    %119 = vector.broadcast %cst_91 : f32 to vector<16x16xf32>
    %120 = arith.maximumf %118, %119 : vector<16x16xf32>
    %c0_92 = arith.constant 0 : index
    %c0_93 = arith.constant 0 : index
    %121 = vector.load %arg6[%c0_92, %c0_93] : memref<16x32xf32, #tpu.memory_space<vmem>>, vector<16x32xf32>
    %cst_94 = arith.constant dense<0.000000e+00> : vector<16x32xf32>
    %122 = tpu.matmul %120, %121, %cst_94 {dimension_numbers = #tpu.dot_dimension_numbers<[1], [0], [0], [1], [0, 0, 1, 1], [], []>} : vector<16x16xf32>, vector<16x32xf32>, vector<16x32xf32> -> vector<16x32xf32>
    %c0_95 = arith.constant 0 : index
    %c0_96 = arith.constant 0 : index
    %123 = vector.load %arg10[%c0_95, %c0_96] : memref<1x32xf32, #tpu.memory_space<vmem>>, vector<1x32xf32>
    %124 = vector.broadcast %123 : vector<1x32xf32> to vector<16x32xf32>
    %125 = arith.addf %122, %124 : vector<16x32xf32>
    %126 = tpu.transpose %125, [1, 0] : vector<16x32xf32> -> vector<32x16xf32>
    %c0_97 = arith.constant 0 : index
    %c0_98 = arith.constant 0 : index
    %c0_99 = arith.constant 0 : index
    %127 = vector.load %arg11[%c0_97, %c0_98, %c0_99] : memref<1x32x16xf32, #tpu.memory_space<vmem>>, vector<1x32x16xf32>
    %128 = vector.shape_cast %127 : vector<1x32x16xf32> to vector<32x16xf32>
    %129 = vector.shape_cast %126 : vector<32x16xf32> to vector<1x32x16xf32>
    tpu.vector_store %arg11[%c0_97, %c0_98, %c0_99], %129 {strides = array<i32>} : memref<1x32x16xf32, #tpu.memory_space<vmem>>, vector<1x32x16xf32>,
    return
  }
  func.func @transform_0(%arg0: i32, %arg1: i32) -> (i32, i32, i32, i32) {
    %c0_i32 = arith.constant 0 : i32
    %c0_i32_0 = arith.constant 0 : i32
    %c0_i32_1 = arith.constant 0 : i32
    return %arg0, %c0_i32, %arg1, %c0_i32_0 : i32, i32, i32, i32
  }
  func.func @transform_1(%arg0: i32, %arg1: i32) -> (i32, i32) {
    %c0_i32 = arith.constant 0 : i32
    %c0_i32_0 = arith.constant 0 : i32
    %c0_i32_1 = arith.constant 0 : i32
    return %c0_i32, %c0_i32_0 : i32, i32
  }
  func.func @transform_2(%arg0: i32, %arg1: i32) -> (i32, i32) {
    %c0_i32 = arith.constant 0 : i32
    %c0_i32_0 = arith.constant 0 : i32
    %c0_i32_1 = arith.constant 0 : i32
    return %c0_i32, %c0_i32_0 : i32, i32
  }
  func.func @transform_3(%arg0: i32, %arg1: i32) -> (i32, i32) {
    %c0_i32 = arith.constant 0 : i32
    %c0_i32_0 = arith.constant 0 : i32
    %c0_i32_1 = arith.constant 0 : i32
    return %c0_i32, %c0_i32_0 : i32, i32
  }
  func.func @transform_4(%arg0: i32, %arg1: i32) -> (i32, i32) {
    %c0_i32 = arith.constant 0 : i32
    %c0_i32_0 = arith.constant 0 : i32
    %c0_i32_1 = arith.constant 0 : i32
    return %c0_i32, %c0_i32_0 : i32, i32
  }
  func.func @transform_5(%arg0: i32, %arg1: i32) -> (i32, i32) {
    %c0_i32 = arith.constant 0 : i32
    %c0_i32_0 = arith.constant 0 : i32
    %c0_i32_1 = arith.constant 0 : i32
    return %c0_i32, %c0_i32_0 : i32, i32
  }
  func.func @transform_6(%arg0: i32, %arg1: i32) -> (i32, i32) {
    %c0_i32 = arith.constant 0 : i32
    %c0_i32_0 = arith.constant 0 : i32
    %c0_i32_1 = arith.constant 0 : i32
    return %c0_i32, %c0_i32_0 : i32, i32
  }
  func.func @transform_7(%arg0: i32, %arg1: i32) -> (i32, i32) {
    %c0_i32 = arith.constant 0 : i32
    %c0_i32_0 = arith.constant 0 : i32
    %c0_i32_1 = arith.constant 0 : i32
    return %c0_i32, %c0_i32_0 : i32, i32
  }
  func.func @transform_8(%arg0: i32, %arg1: i32) -> (i32, i32) {
    %c0_i32 = arith.constant 0 : i32
    %c0_i32_0 = arith.constant 0 : i32
    %c0_i32_1 = arith.constant 0 : i32
    return %c0_i32, %c0_i32_0 : i32, i32
  }
  func.func @transform_9(%arg0: i32, %arg1: i32) -> (i32, i32, i32) {
    %c0_i32 = arith.constant 0 : i32
    %c0_i32_0 = arith.constant 0 : i32
    return %arg0, %c0_i32, %arg1 : i32, i32, i32
  }
}

</mosaic_0001>

<bundles_post_ra>
// kernel: tpu_custom_call.1
= control target key start
LH: loop header
LB: loop body
LE: loop exit
PB: predicated region body
PF: predicated region fallthrough
CT: control target
= control target key end

     0   :  { %14 = vsyncpa [#allocation3], 0  ;;  %s4120_s0 = inlined_call_operand.hbm [shape: f32[2,25,16,32], index: 0, kind: input, shape index: {}]   ;;  %s4121_s1 = inlined_call_operand.vmem [shape: f32[32,16], index: 1, kind: input, shape index: {}]   ;;  %s4122_s2 = inlined_call_operand.vmem [shape: f32[144,16], index: 2, kind: input, shape index: {}]   ;;  %s4123_s3 = inlined_call_operand.vmem [shape: f32[144,16], index: 3, kind: input, shape index: {}]   ;;  %s4124_s4 = inlined_call_operand.vmem [shape: f32[16,32], index: 4, kind: input, shape index: {}]   ;;  %s4125_s5 = inlined_call_operand.vmem [shape: f32[1,16], index: 5, kind: input, shape index: {}]   ;;  %s4126_s6 = inlined_call_operand.vmem [shape: f32[1,16], index: 6, kind: input, shape index: {}]   ;;  %s4127_s7 = inlined_call_operand.vmem [shape: f32[1,16], index: 7, kind: input, shape index: {}]   ;;  %s4128_s8 = inlined_call_operand.vmem [shape: f32[1,32], index: 8, kind: input, shape index: {}]   ;;  %s4129_s9 = inlined_call_operand.vmem [shape: f32[2,32,16], index: 9, kind: output, shape index: {}]  }
   0x1   :  { %16 = vsyncpa [#allocation3 + $0x1], 0  ;;  %s3034_s30 = smov 0   ;;  %s3036_s10 = smov 0  }
   0x2   :  { %s3038_s11 = smov 0   ;;  %s3040_s12 = smov 0  }
   0x3   :  { %s3042_s13 = smov 0   ;;  %s3044_s14 = smov 0  }
   0x4 LB: > { %s2167_s15 = sadd.s32 4294967295, %s2971_s14   ;;  %s34_s16 = sadd.s32 1, %s2967_s13  ;;  %s2971_s14 = sphi %s3044_s14, %s22_s14   ;;  %s2967_s13 = sphi %s3042_s13, %s4218_s13   ;;  %s2963_s12 = sphi %s3040_s12, %s4217_s12   ;;  %s2959_s11 = sphi %s3038_s11, %s4216_s11   ;;  %s2955_s10 = sphi %s3036_s10, %s4215_s10   ;;  %s2951_s30 = sphi %s3034_s30, %s4214_s30  }
   0x5   : > { %p36_p0 = scmp.ge.s32.totalorder %s34_s16, 2  ;;  %s43_s17 = sadd.s32 1, %s2959_s11 }
   0x6   : > { %p50_p1 = scmp.ne.s32.totalorder %s2959_s11, %s2955_s10  ;;  %p51_p2 = scmp.eq.s32.totalorder %s2971_s14, 0 }
   0x7   : > { %s4220_s16 = smov (%p36_p0, %s34_s16), 0  ;;  %p56_p4 = scmp.ne.s32.totalorder %s2955_s10, %s2951_s30 }
   0x8   : > { %p52_p3 = por %p51_p2, %p50_p1  ;;  %s38_s18 = ssub.s32 %s2967_s13, %s4220_s16 }
   0x9   : > { %p57_p5 = scmp.eq.s32.totalorder %s2167_s15, 0  ;;  %p41_p6 = scmp.eq.s32.totalorder %s38_s18, 0 }
   0xa   : > { %p2525_p8 = scmp.lt.s32.totalorder %s2971_s14, 2  ;;  %s300_s21 = sand.u32 1, %s2959_s11  }
   0xb   : > { %p3073_p7 = por %p57_p5, %p56_p4  ;;  %s2517_s22 = smul.u32 6400, %s2967_s13 }
   0xc   : > { %s3079_s20 = scalar_select %p41_p6, %s2959_s11, %s43_s17  }
   0xd   : > { %s2516_s23 = smul.u32 400, %s300_s21  ;;  %s3086_s26 = scalar_lea.hbm %s4120_s0, %s2517_s22 }
   0xe   : > { %p3088_p9 = pnand %p2525_p8, %p52_p3  ;;  %s3094_s30 = scalar_lea.sflag [#allocation3], %s300_s21 }
   0xf   : > { %s304_s28 = scalar_lea.vmem [#allocation2], %s2516_s23  ;;  %s2891_s15 = scalar_lea.hbm %s3086_s26, 6400 }
  0x10   : > { %s313_s29 = sshll.u32 %s304_s28, 4  ;;  %p2892_p10 = scmp.ne.s32.totalorder %s3086_s26, %s2891_s15  ;;  %s3092_s29 = int_to_ptr.vmem [resolvable:$true] %s313_s29 }
  0x11   : > { %p2893_p11 = pneg %p3088_p9  ;;  %s2896_s22 = scalar_lea.hbm %s4120_s0, 12800 }
  0x12   : > { %p2897_p0 = scmp.lt.u32.totalorder %s3086_s26, %s4120_s0  ;;  %p2898_p1 = scmp.lt.u32.totalorder %s2896_s22, %s2891_s15 }
  0x13   : > { %p2894_p12 = pnand %p2893_p11, %p2892_p10  ;;  %p2900_p3 = scmp.lt.u32.totalorder %s2891_s15, %s3086_s26 }
  0x14   : > { %p2899_p2 = por %p2898_p1, %p2897_p0 }
  0x15   : > { %p2895_p13 = pneg %p2894_p12 }
  0x16   : > { %p2901_p4 = por %p2900_p3, %p2899_p2 }
  0x18   : > { %p2902_p5 = pnand %p2901_p4, %p2895_p13 }
  0x1a   : > { %2905 = shalt.err (!%p2902_p5)
}
  0x1b   : > { %s2906_s21 = scalar_lea.vmem %s3092_s29, 6400  ;;  %s2973_s23 = smov [#allocation2]  }
  0x1c   : > { %p2907_p6 = scmp.ne.s32.totalorder %s3092_s29, %s2906_s21  ;;  %s2911_s28 = sshll.u32 %s2973_s23, 4  ;;  %s2912_s28 = int_to_ptr.vmem [resolvable:$false] %s2911_s28 }
  0x1d   : > { %s2913_s17 = scalar_lea.vmem %s2912_s28, 12800  ;;  %p2914_p12 = scmp.lt.s32.totalorder %s3092_s29, %s2912_s28 }
  0x1e   : > { %p2909_p8 = pnand %p2907_p6, %p2893_p11  ;;  %p2915_p0 = scmp.lt.s32.totalorder %s2913_s17, %s2906_s21 }
  0x20   : > { %p2910_p10 = pneg %p2909_p8  ;;  %p2916_p1 = por %p2915_p0, %p2914_p12 }
  0x22   : > { %p2917_p2 = pnand %p2916_p1, %p2910_p10 }
  0x24   : > { %2920 = shalt.err (!%p2917_p2)
}
  0x25   : > { %s2974_s15 = smov 128   ;;  %s2975_s18 = smov 8  }
  0x26   : > { %2524 = dma.hbm_to_vmem [thread:$0]  (!%p3088_p9), %s3086_s26, 6400, %s3092_s29, %s3094_s30, %s2974_s15, %s2974_s15, %s2975_s18  }
  0x27   : > { %p2172_p11 = scmp.ge.s32.totalorder %s2971_s14, 1  ;;  %p321_p13 = scmp.lt.s32.totalorder %s2971_s14, 3 }
  0x29   : > { %p322_p3 = pnand %p2172_p11, %p321_p13 }
  0x2b   : > { %325 = sbr.rel (%p322_p3) target bundleno = 1437 (0x59d), region = 56 }
  0x32   : > { %s327_s22 = sand.u32 1, %s2955_s10  }
  0x33   : > { %s2518_s24 = smul.u32 400, %s327_s22  ;;  %s328_s25 = scalar_lea.sflag [#allocation3], %s327_s22 }
  0x35   : > { %s3125_s21 = scalar_lea.vmem [#allocation2], %s2518_s24 }
  0x36   : > { %2946 = dma.done.wait (%p3073_p7), %s328_s25, 6400  }
  0x37   : > { %2948 = vsyncadd (%p3073_p7), %s328_s25, 4294960896  ;;  %vm463_vm0 = vcmask 261120   ;;  %v452_v0 = vld [vmem:[%s4121_s1] sm:$0xff]  ;;  %v453_v1 = vld [vmem:[%s4121_s1 + $0x8] sm:$0xff]  ;;  %s2976_s22 = smov 16   ;;  %s2977_s24 = smov 32  }
  0x38   : > { %v454_v2 = vld [vmem:[%s4121_s1 + $0x10] sm:$0xff]  ;;  %v2450_v3 = vpack.c.bf16 %v453_v1, %v452_v0  ;;  %v455_v4 = vld [vmem:[%s4121_s1 + $0x18] sm:$0xff]  ;;  %v3250_v58 = vld [vmem:[%s4125_s5] ss:$0 sm:$0xff]  ;;  %s2979_s25 = smov 48   ;;  %s2980_s30 = smov 64  }
  0x39   : > { %v378_v5 = vld [vmem:[%s3125_s21] sm:$0xff]  ;;  %v2454_v6 = vpack.c.bf16 %v455_v4, %v454_v2  ;;  %v379_v7 = vld [vmem:[%s3125_s21 + $0x8] sm:$0xff]  ;;  %v2175_v8 = vld [vmem:[%s3125_s21 + $0x10] sm:$0xff]  ;;  %s2981_s15 = smov 80   ;;  %vm1403_vm1 = vcmask 130048   ;;  %s4165_s19 = smov 96  }
  0x3a   : > { %2368 = vmatprep.mubr.msk.f32.mxu0 %vm463_vm0, %v378_v5  ;;  %2451 = vmatprep.subr.bf16.mxu0 %v2450_v3  ;;  %v2176_v9 = vld [vmem:[%s3125_s21 + $0x18] sm:$0xff]  ;;  %v2177_v10 = vld [vmem:[%s3125_s21 + $0x20] sm:$0xff]  ;;  %v2178_v11 = vld [vmem:[%s3125_s21 + $0x28] sm:$0xff]  ;;  %s4163_s17 = smov 112   ;;  %vm1440_vm2 = vcmask 392192   ;;  %vm1459_vm3 = vcmask 523264  }
  0x3b   : > { %2453 = vmatpush3.bf16.msra.mxu0 %v2450_v3  ;;  %v2179_v12 = vld [vmem:[%s3125_s21 + $0x30] sm:$0xff]  ;;  %v2180_v13 = vld [vmem:[%s3125_s21 + $0x38] sm:$0xff]  ;;  %v2181_v14 = vld [vmem:[%s3125_s21 + $0x40] sm:$0xff]  ;;  %vm1478_vm4 = vcmask 654336   ;;  %vm1497_vm5 = vcmask 785408   ;;  %vm1516_vm6 = vcmask 916480  }
  0x3c   : > { %2455 = vmatprep.subr.bf16.mxu0 %v2454_v6  ;;  %v2182_v15 = vld [vmem:[%s3125_s21 + $0x48] sm:$0xff]  ;;  %v2183_v16 = vld [vmem:[%s3125_s21 + $0x50] sm:$0xff]  ;;  %v2184_v17 = vld [vmem:[%s3125_s21 + $0x58] sm:$0xff]  ;;  %p370_p7 = scmp.lt.s32.totalorder %s2963_s12, 1 }
  0x3d   : > { %v2185_v18 = vld [vmem:[%s3125_s21 + $0x60] sm:$0xff]  ;;  %v2186_v19 = vld [vmem:[%s3125_s21 + $0x68] sm:$0xff]  ;;  %v2187_v20 = vld [vmem:[%s3125_s21 + $0x70] sm:$0xff] }
  0x3e   : > { %v2188_v21 = vld [vmem:[%s3125_s21 + $0x78] sm:$0xff]  ;;  %v2189_v22 = vld [vmem:[%s3125_s21 + $0x80] sm:$0xff]  ;;  %v2190_v23 = vld [vmem:[%s3125_s21 + $0x88] sm:$0xff]  ;;  %s4222_s12 = smov (!%p370_p7, %s2963_s12), 1 }
  0x3f   : > { %2457 = vmatpush3.bf16.msra.mxu0 %v2454_v6  ;;  %v2191_v24 = vld [vmem:[%s3125_s21 + $0x90] sm:$0xff]  ;;  %v2192_v25 = vld [vmem:[%s3125_s21 + $0x98] sm:$0xff]  ;;  %v2193_v26 = vld [vmem:[%s3125_s21 + $0xa0] sm:$0xff] }
  0x40   : > { %v2194_v27 = vld [vmem:[%s3125_s21 + $0xa8] sm:$0xff]  ;;  %v2195_v28 = vld [vmem:[%s3125_s21 + $0xb0] sm:$0xff]  ;;  %v2196_v29 = vld [vmem:[%s3125_s21 + $0xb8] sm:$0xff] }
  0x41   : > { %v2197_v30 = vld [vmem:[%s3125_s21 + $0xc0] sm:$0xff]  ;;  %v2198_v31 = vld [vmem:[%s3125_s21 + $0xc8] sm:$0xff]  ;;  %v2199_v32 = vld [vmem:[%s3125_s21 + $0xd0] sm:$0xff] }
  0x42   : > { %2369 = vmatmul.mubr.msk.f32.vlgmr.msra.gmra.mrb[0].mxu0 %vm463_vm0, %v379_v7  ;;  %v2200_v33 = vld [vmem:[%s3125_s21 + $0xd8] sm:$0xff]  ;;  %v2201_v34 = vld [vmem:[%s3125_s21 + $0xe0] sm:$0xff]  ;;  %v2202_v35 = vld [vmem:[%s3125_s21 + $0xe8] sm:$0xff] }
  0x43   : > { %2371 = vmatprep.mubr.msk.f32.mxu0 %vm463_vm0, %v2175_v8  ;;  %v2203_v36 = vld [vmem:[%s3125_s21 + $0xf0] sm:$0xff]  ;;  %v2204_v37 = vld [vmem:[%s3125_s21 + $0xf8] sm:$0xff]  ;;  %v2205_v38 = vld [vmem:[%s3125_s21 + $0x100] sm:$0xff] }
  0x44   : > { %v2206_v39 = vld [vmem:[%s3125_s21 + $0x108] sm:$0xff]  ;;  %v2207_v40 = vld [vmem:[%s3125_s21 + $0x110] sm:$0xff]  ;;  %v2208_v41 = vld [vmem:[%s3125_s21 + $0x118] sm:$0xff] }
  0x45   : > { %v2209_v42 = vld [vmem:[%s3125_s21 + $0x120] sm:$0xff]  ;;  %v2210_v43 = vld [vmem:[%s3125_s21 + $0x128] sm:$0xff]  ;;  %v2211_v44 = vld [vmem:[%s3125_s21 + $0x130] sm:$0xff] }
  0x46   : > { %2372 = vmatmul.mubr.msk.f32.gmra.mrb[2].mxu0 %vm463_vm0, %v2176_v9  ;;  %v2212_v45 = vld [vmem:[%s3125_s21 + $0x138] sm:$0xff]  ;;  %v2213_v46 = vld [vmem:[%s3125_s21 + $0x140] sm:$0xff]  ;;  %v2214_v47 = vld [vmem:[%s3125_s21 + $0x148] sm:$0xff] }
  0x47   : > { %2374 = vmatprep.mubr.msk.f32.mxu0 %vm463_vm0, %v2177_v10  ;;  %v2215_v48 = vld [vmem:[%s3125_s21 + $0x150] sm:$0xff]  ;;  %v2216_v49 = vld [vmem:[%s3125_s21 + $0x158] sm:$0xff]  ;;  %v2217_v50 = vld [vmem:[%s3125_s21 + $0x160] sm:$0xff] }
  0x48   : > { %v2218_v51 = vld [vmem:[%s3125_s21 + $0x168] sm:$0xff]  ;;  %v2219_v52 = vld [vmem:[%s3125_s21 + $0x170] sm:$0xff]  ;;  %v2220_v53 = vld [vmem:[%s3125_s21 + $0x178] sm:$0xff] }
  0x49   : > { %v2221_v54 = vld [vmem:[%s3125_s21 + $0x180] sm:$0xff]  ;;  %v2222_v55 = vld [vmem:[%s3125_s21 + $0x188] sm:$0xff] }
  0x4a   : > { %2375 = vmatmul.mubr.msk.f32.gmra.mrb[4].mxu0 %vm463_vm0, %v2178_v11 }
  0x4b   : > { %2377 = vmatprep.mubr.msk.f32.mxu0 %vm463_vm0, %v2179_v12 }
  0x4e   : > { %2378 = vmatmul.mubr.msk.f32.gmra.mrb[6].mxu0 %vm463_vm0, %v2180_v13 }
  0x4f   : > { %2380 = vmatprep.mubr.msk.f32.mxu0 %vm463_vm0, %v2181_v14 }
  0x52   : > { %2381 = vmatmul.mubr.msk.f32.gmra.mrb[8].mxu0 %vm463_vm0, %v2182_v15 }
  0x53   : > { %2383 = vmatprep.mubr.msk.f32.mxu0 %vm463_vm0, %v2183_v16 }
  0x56   : > { %2384 = vmatmul.mubr.msk.f32.gmra.mrb[10].mxu0 %vm463_vm0, %v2184_v17 }
  0x57   : > { %2386 = vmatprep.mubr.msk.f32.mxu0 %vm463_vm0, %v2185_v18  ;;  %v1535_v18 = vld [vmem:[%s4122_s2] sm:$0xff] }
  0x5a   : > { %2387 = vmatmul.mubr.msk.f32.gmra.mrb[12].mxu0 %vm463_vm0, %v2186_v19  ;;  %v1536_v19 = vld [vmem:[%s4122_s2 + $0x8] sm:$0xff] }
  0x5b   : > { %2389 = vmatprep.mubr.msk.f32.mxu0 %vm463_vm0, %v2187_v20 }
  0x5e   : > { %2390 = vmatmul.mubr.msk.f32.gmra.mrb[14].mxu0 %vm463_vm0, %v2188_v21 }
  0x5f   : > { %2392 = vmatprep.mubr.msk.f32.mxu0 %vm463_vm0, %v2189_v22  ;;  %v4130_v22 = vmov 0.0|0.0  }
  0x60   : > { %2458 = vmatprep.subr.bf16.mxu1 %v4130_v22  ;;  %2485 = vmatprep.subr.bf16.mxu0 %v4130_v22 }
  0x62   : > { %2393 = vmatmul.mubr.msk.f32.gmra.mrb[16].mxu0 %vm463_vm0, %v2190_v23  ;;  %v2459_v23 = vpack.c.bf16 %v1536_v19, %v1535_v18 }
  0x63   : > { %2395 = vmatprep.mubr.msk.f32.mxu0 %vm463_vm0, %v2191_v24 }
  0x64   : > { %2460 = vmatpush1.bf16.msra.mxu1 %v2459_v23 }
  0x65   : > { %2461 = vmatprep.subr.bf16.mxu1 %v4130_v22 }
  0x66   : > { %2396 = vmatmul.mubr.msk.f32.gmra.mrb[18].mxu0 %vm463_vm0, %v2192_v25 }
  0x67   : > { %2398 = vmatprep.mubr.msk.f32.mxu0 %vm463_vm0, %v2193_v26 }
  0x6a   : > { %2399 = vmatmul.mubr.msk.f32.gmra.mrb[20].mxu0 %vm463_vm0, %v2194_v27 }
  0x6b   : > { %2401 = vmatprep.mubr.msk.f32.mxu0 %vm463_vm0, %v2195_v28 }
  0x6e   : > { %2402 = vmatmul.mubr.msk.f32.gmra.mrb[22].mxu0 %vm463_vm0, %v2196_v29  ;;  %v1537_v29 = vld [vmem:[%s4122_s2 + $0x10] sm:$0xff] }
  0x6f   : > { %2404 = vmatprep.mubr.msk.f32.mxu0 %vm463_vm0, %v2197_v30  ;;  %v1538_v30 = vld [vmem:[%s4122_s2 + $0x18] sm:$0xff] }
  0x72   : > { %2405 = vmatmul.mubr.msk.f32.gmra.mrb[24].mxu0 %vm463_vm0, %v2198_v31 }
  0x73   : > { %2407 = vmatprep.mubr.msk.f32.mxu0 %vm463_vm0, %v2199_v32 }
  0x76   : > { %2408 = vmatmul.mubr.msk.f32.gmra.mrb[26].mxu0 %vm463_vm0, %v2200_v33  ;;  %v2462_v33 = vpack.c.bf16 %v1538_v30, %v1537_v29 }
  0x77   : > { %2410 = vmatprep.mubr.msk.f32.mxu0 %vm463_vm0, %v2201_v34 }
  0x78   : > { %2463 = vmatpush1.bf16.msra.mxu1 %v2462_v33 }
  0x79   : > { %2464 = vmatprep.subr.bf16.mxu1 %v4130_v22 }
  0x7a   : > { %2411 = vmatmul.mubr.msk.f32.gmra.mrb[28].mxu0 %vm463_vm0, %v2202_v35 }
  0x7b   : > { %2413 = vmatprep.mubr.msk.f32.mxu0 %vm463_vm0, %v2203_v36 }
  0x7e   : > { %2414 = vmatmul.mubr.msk.f32.gmra.mrb[30].mxu0 %vm463_vm0, %v2204_v37 }
  0x7f   : > { %2416 = vmatprep.mubr.msk.f32.mxu0 %vm463_vm0, %v2205_v38 }
  0x82   : > { %2417 = vmatmul.mubr.msk.f32.gmra.mrb[32].mxu0 %vm463_vm0, %v2206_v39  ;;  %v1539_v39 = vld [vmem:[%s4122_s2 + $0x20] sm:$0xff] }
  0x83   : > { %2419 = vmatprep.mubr.msk.f32.mxu0 %vm463_vm0, %v2207_v40  ;;  %v1540_v40 = vld [vmem:[%s4122_s2 + $0x28] sm:$0xff] }
  0x86   : > { %2420 = vmatmul.mubr.msk.f32.gmra.mrb[34].mxu0 %vm463_vm0, %v2208_v41 }
  0x87   : > { %2422 = vmatprep.mubr.msk.f32.mxu0 %vm463_vm0, %v2209_v42 }
  0x8a   : > { %2423 = vmatmul.mubr.msk.f32.gmra.mrb[36].mxu0 %vm463_vm0, %v2210_v43  ;;  %v2465_v43 = vpack.c.bf16 %v1540_v40, %v1539_v39 }
  0x8b   : > { %2425 = vmatprep.mubr.msk.f32.mxu0 %vm463_vm0, %v2211_v44 }
  0x8c   : > { %2466 = vmatpush1.bf16.msra.mxu1 %v2465_v43 }
  0x8d   : > { %2467 = vmatprep.subr.bf16.mxu1 %v4130_v22 }
  0x8e   : > { %2426 = vmatmul.mubr.msk.f32.gmra.mrb[38].mxu0 %vm463_vm0, %v2212_v45 }
  0x8f   : > { %2428 = vmatprep.mubr.msk.f32.mxu0 %vm463_vm0, %v2213_v46 }
  0x92   : > { %2429 = vmatmul.mubr.msk.f32.gmra.mrb[40].mxu0 %vm463_vm0, %v2214_v47 }
  0x93   : > { %2431 = vmatprep.mubr.msk.f32.mxu0 %vm463_vm0, %v2215_v48 }
  0x96   : > { %2432 = vmatmul.mubr.msk.f32.gmra.mrb[42].mxu0 %vm463_vm0, %v2216_v49  ;;  %v1541_v49 = vld [vmem:[%s4122_s2 + $0x30] sm:$0xff] }
  0x97   : > { %2434 = vmatprep.mubr.msk.f32.mxu0 %vm463_vm0, %v2217_v50  ;;  %v1542_v50 = vld [vmem:[%s4122_s2 + $0x38] sm:$0xff] }
  0x9a   : > { %2435 = vmatmul.mubr.msk.f32.gmra.mrb[44].mxu0 %vm463_vm0, %v2218_v51 }
  0x9b   : > { %2437 = vmatprep.mubr.msk.f32.mxu0 %vm463_vm0, %v2219_v52 }
  0x9e   : > { %2438 = vmatmul.mubr.msk.f32.gmra.mrb[46].mxu0 %vm463_vm0, %v2220_v53 }
  0x9f   : > { %2440 = vmatprep.mubr.msk.f32.mxu0 %vm463_vm0, %v2221_v54  ;;  %v2468_v54 = vpack.c.bf16 %v1542_v50, %v1541_v49  ;;  %v1552_v49 = vld [vmem:[%s4122_s2 + $0x88] sm:$0xff] }
  0xa1   : > { %2469 = vmatpush1.bf16.msra.mxu1 %v2468_v54 }
  0xa2   : > { %2441 = vmatmul.mubr.msk.f32.gmra.mrb[48].mxu0 %vm463_vm0, %v2222_v55  ;;  %2470 = vmatprep.subr.bf16.mxu1 %v4130_v22 }
 0x115   : > { %v3243_v56 = vpop.f32.mrb[0].mxu0 }
 0x116   : > { %v3245_v57 = vpop.f32.mrb[1].mxu0 }
 0x119   : > { %v2373_v59 = vpop.f32.mrb[2].mxu0 }
 0x11a   : > { %v3253_v60 = vadd.f32 %v2373_v59, %v3250_v58  ;;  %v690_v61 = vpop.f32.mrb[3].mxu0 }
 0x11b   : > { %v3256_v62 = vadd.f32 %v3250_v58, %v690_v61 }
 0x11c   : > { %v4154_v63 = vmax.f32 %v3253_v60, 0.0 }
 0x11d   : > { %v4155_v0 = vmax.f32 %v3256_v62, 0.0  ;;  %v2376_v1 = vpop.f32.mrb[4].mxu0 }
 0x11e   : > { %v3261_v2 = vadd.f32 %v2376_v1, %v3250_v58  ;;  %v700_v3 = vpop.f32.mrb[5].mxu0 }
 0x11f   : > { %v3264_v4 = vadd.f32 %v3250_v58, %v700_v3  ;;  %v2585_v5 = vpack.i.bf16 %v4154_v63, %v4155_v0  ;;  %v1543_v3 = vld [vmem:[%s4122_s2 + $0x40] sm:$0xff] }
 0x120   : > { %v4149_v6 = vmax.f32 %v3261_v2, 0.0 }
 0x121   : > { %v4151_v7 = vmax.f32 %v3264_v4, 0.0  ;;  %v2379_v8 = vpop.f32.mrb[6].mxu0  ;;  %2586 = vrot.lane.b32.xlu0 %v2585_v5, %s2976_s22  ;;  %v1544_v5 = vld [vmem:[%s4122_s2 + $0x48] sm:$0xff] }
 0x122   : > { %v716_v9 = vadd.f32 %v2379_v8, %v3250_v58  ;;  %v710_v10 = vpop.f32.mrb[7].mxu0 }
 0x123   : > { %v711_v11 = vadd.f32 %v3250_v58, %v710_v10  ;;  %v2595_v12 = vpack.i.bf16 %v4149_v6, %v4151_v7 }
 0x124   : > { %v936_v13 = vmax.f32 %v716_v9, 0.0 }
 0x125   : > { %v935_v14 = vmax.f32 %v711_v11, 0.0  ;;  %v2382_v15 = vpop.f32.mrb[8].mxu0  ;;  %2596 = vrot.lane.b32.xlu1 %v2595_v12, %s2976_s22  ;;  %2591 = vrot.lane.b32.xlu0 %v2595_v12, %s2977_s24  ;;  %v2471_v11 = vpack.c.bf16 %v1544_v5, %v1543_v3 }
 0x126   : > { %v726_v16 = vadd.f32 %v2382_v15, %v3250_v58  ;;  %v720_v17 = vpop.f32.mrb[9].mxu0 }
 0x127   : > { %v2605_v20 = vpack.i.bf16 %v936_v13, %v935_v14  ;;  %v721_v21 = vadd.f32 %v3250_v58, %v720_v17  ;;  %2472 = vmatpush1.bf16.msra.mxu1 %v2471_v11  ;;  %v1546_v17 = vld [vmem:[%s4122_s2 + $0x58] sm:$0xff] }
 0x128   : > { %v938_v24 = vmax.f32 %v726_v16, 0.0  ;;  %v1545_v16 = vld [vmem:[%s4122_s2 + $0x50] sm:$0xff]  ;;  %2473 = vmatprep.subr.bf16.mxu1 %v4130_v22 }
 0x129   : > { %v937_v25 = vmax.f32 %v721_v21, 0.0  ;;  %v2385_v26 = vpop.f32.mrb[10].mxu0  ;;  %2601 = vrot.lane.b32.xlu0 %v2605_v20, %s2977_s24  ;;  %v2474_v21 = vpack.c.bf16 %v1546_v17, %v1545_v16 }
 0x12a   : > { %v3293_v27 = vadd.f32 %v2385_v26, %v3250_v58  ;;  %v730_v28 = vpop.f32.mrb[11].mxu0  ;;  %v1547_v26 = vld [vmem:[%s4122_s2 + $0x60] sm:$0xff] }
 0x12b   : > { %v2610_v31 = vpack.i.bf16 %v938_v24, %v937_v25  ;;  %v3303_v32 = vadd.f32 %v3250_v58, %v730_v28  ;;  %2475 = vmatpush1.bf16.msra.mxu1 %v2474_v21  ;;  %v1548_v28 = vld [vmem:[%s4122_s2 + $0x68] sm:$0xff] }
 0x12c   : > { %v4143_v34 = vmax.f32 %v3293_v27, 0.0  ;;  %2476 = vmatprep.subr.bf16.mxu1 %v4130_v22  ;;  %v2477_v30 = vpack.c.bf16 %v1548_v28, %v1547_v26 }
 0x12d   : > { %v4144_v35 = vmax.f32 %v3303_v32, 0.0  ;;  %v2388_v36 = vpop.f32.mrb[12].mxu0  ;;  %2611 = vrot.lane.b32.xlu1 %v2610_v31, %s2977_s24  ;;  %2606 = vrot.lane.b32.xlu0 %v2605_v20, %s2976_s22 }
 0x12e   : > { %v3310_v37 = vadd.f32 %v2388_v36, %v3250_v58  ;;  %v740_v38 = vpop.f32.mrb[13].mxu0  ;;  %v1549_v36 = vld [vmem:[%s4122_s2 + $0x70] sm:$0xff] }
 0x12f   : > { %v2615_v41 = vpack.i.bf16 %v4143_v34, %v4144_v35  ;;  %v3323_v42 = vadd.f32 %v3250_v58, %v740_v38  ;;  %2478 = vmatpush1.bf16.msra.mxu1 %v2477_v30  ;;  %v1550_v38 = vld [vmem:[%s4122_s2 + $0x78] sm:$0xff] }
 0x130   : > { %v4141_v44 = vmax.f32 %v3310_v37, 0.0  ;;  %2479 = vmatprep.subr.bf16.mxu1 %v4130_v22  ;;  %v2480_v39 = vpack.c.bf16 %v1550_v38, %v1549_v36 }
 0x131   : > { %v4140_v45 = vmax.f32 %v3323_v42, 0.0  ;;  %v2391_v46 = vpop.f32.mrb[14].mxu0  ;;  %2616 = vrot.lane.b32.xlu1 %v2615_v41, %s2979_s25 }
 0x132   : > { %v3330_v47 = vadd.f32 %v2391_v46, %v3250_v58  ;;  %v750_v48 = vpop.f32.mrb[15].mxu0 }
 0x133   : > { %v3339_v51 = vadd.f32 %v3250_v58, %v750_v48  ;;  %v2620_v52 = vpack.i.bf16 %v4141_v44, %v4140_v45  ;;  %2481 = vmatpush1.bf16.msra.mxu1 %v2480_v39  ;;  %v1551_v48 = vld [vmem:[%s4122_s2 + $0x80] sm:$0xff] }
 0x134   : > { %v4137_v53 = vmax.f32 %v3330_v47, 0.0  ;;  %2482 = vmatprep.subr.bf16.mxu1 %v4130_v22  ;;  %v2483_v54 = vpack.c.bf16 %v1552_v49, %v1551_v48 }
 0x135   : > { %v4139_v55 = vmax.f32 %v3339_v51, 0.0  ;;  %2621 = vrot.lane.b32.xlu1 %v2620_v52, %s2980_s30  ;;  %v2394_v59 = vpop.f32.mrb[16].mxu0 }
 0x136   : > { %v766_v61 = vadd.f32 %v2394_v59, %v3250_v58  ;;  %v760_v1 = vpop.f32.mrb[17].mxu0 }
 0x137   : > { %v2635_v8 = vpack.i.bf16 %v4137_v53, %v4139_v55  ;;  %v761_v9 = vadd.f32 %v3250_v58, %v760_v1  ;;  %2484 = vmatpush1.bf16.msra.mxu1 %v2483_v54 }
 0x138   : > { %v946_v10 = vmax.f32 %v766_v61, 0.0 }
 0x139   : > { %2626 = vrot.lane.b32.xlu1 %v2620_v52, %s2979_s25  ;;  %2636 = vrot.lane.b32.xlu0 %v2635_v8, %s2981_s15  ;;  %v945_v12 = vmax.f32 %v761_v9, 0.0  ;;  %v2397_v13 = vpop.f32.mrb[18].mxu0 }
 0x13a   : > { %v776_v14 = vadd.f32 %v2397_v13, %v3250_v58  ;;  %v770_v15 = vpop.f32.mrb[19].mxu0 }
 0x13b   : > { %v2660_v18 = vpack.i.bf16 %v946_v10, %v945_v12  ;;  %v771_v19 = vadd.f32 %v3250_v58, %v770_v15 }
 0x13c   : > { %v948_v20 = vmax.f32 %v776_v14, 0.0 }
 0x13d   : > { %2631 = vrot.lane.b32.xlu1 %v2620_v52, %s2976_s22  ;;  %2641 = vrot.lane.b32.xlu0 %v2635_v8, %s2980_s30  ;;  %v947_v23 = vmax.f32 %v771_v19, 0.0  ;;  %v2400_v24 = vpop.f32.mrb[20].mxu0 }
 0x13e   : > { %v780_v25 = vpop.f32.mrb[21].mxu0  ;;  %v3392_v40 = vadd.f32 %v2400_v24, %v3250_v58 }
 0x13f   : > { %v2685_v29 = vpack.i.bf16 %v948_v20, %v947_v23  ;;  %v3397_v41 = vadd.f32 %v3250_v58, %v780_v25 }
 0x140   : > { %v4134_v52 = vmax.f32 %v3392_v40, 0.0 }
 0x141   : > { %2661 = vrot.lane.b32.xlu1 %v2660_v18, %s2981_s15  ;;  %2646 = vrot.lane.b32.xlu0 %v2635_v8, %s2979_s25  ;;  %v2403_v31 = vpop.f32.mrb[22].mxu0  ;;  %v4135_v59 = vmax.f32 %v3397_v41, 0.0 }
 0x142   : > { %v790_v33 = vpop.f32.mrb[23].mxu0  ;;  %v3412_v61 = vadd.f32 %v2403_v31, %v3250_v58 }
 0x143   : > { %v3415_v1 = vadd.f32 %v3250_v58, %v790_v33  ;;  %v2690_v12 = vpack.i.bf16 %v4134_v52, %v4135_v59 }
 0x144   : > { %4169 = vst [vmem:[#allocation5_spill] sm:$0xff] %v3412_v61  ;;  %v4132_v10 = vmax.f32 %v3412_v61, 0.0 }
 0x145   : > { %2666 = vrot.lane.b32.xlu1 %v2660_v18, %s2980_s30  ;;  %2651 = vrot.lane.b32.xlu0 %v2635_v8, %s2977_s24  ;;  %v2406_v43 = vpop.f32.mrb[24].mxu0  ;;  %4170 = vst [vmem:[#allocation6_spill] sm:$0xff] %v3415_v1  ;;  %v4133_v11 = vmax.f32 %v3415_v1, 0.0 }
 0x146   : > { %v800_v46 = vpop.f32.mrb[25].mxu0 }
 0x147   : > { %v801_v50 = vadd.f32 %v3250_v58, %v800_v46  ;;  %v2700_v16 = vpack.i.bf16 %v4132_v10, %v4133_v11 }
 0x149   : > { %2671 = vrot.lane.b32.xlu1 %v2660_v18, %s2977_s24  ;;  %2656 = vrot.lane.b32.xlu0 %v2635_v8, %s2976_s22  ;;  %v3417_v3 = vmax.f32 %v801_v50, 0.0  ;;  %v2409_v5 = vpop.f32.mrb[26].mxu0  ;;  %v806_v8 = vadd.f32 %v2406_v43, %v3250_v58 }
 0x14a   : > { %v810_v9 = vpop.f32.mrb[27].mxu0  ;;  %v3457_v43 = vadd.f32 %v2409_v5, %v3250_v58 }
 0x14b   : > { %4171 = vst [vmem:[#allocation7_spill] sm:$0xff] %v3417_v3  ;;  %2275 = vmatprep.mubr.msk.f32.mxu1 %vm1403_vm1, %v3417_v3  ;;  %v3430_v15 = vmax.f32 %v806_v8, 0.0  ;;  %v3460_v46 = vadd.f32 %v3250_v58, %v810_v9 }
 0x14c   : > { %v4152_v50 = vmax.f32 %v3457_v43, 0.0 }
 0x14d   : > { %2676 = vrot.lane.b32.xlu1 %v2660_v18, %s2976_s22  ;;  %2681 = vrot.lane.b32.xlu0 %v2685_v29, %s2981_s15  ;;  %v2412_v13 = vpop.f32.mrb[28].mxu0  ;;  %v3444_v23 = vpack.i.bf16 %v3430_v15, %v3417_v3  ;;  %v4153_v54 = vmax.f32 %v3460_v46, 0.0 }
 0x14e   : > { %v820_v14 = vpop.f32.mrb[29].mxu0 }
 0x14f   : > { %v3478_v5 = vpack.i.bf16 %v4152_v50, %v4153_v54 }
 0x151   : > { %2691 = vrot.lane.b32.xlu1 %v2690_v12, %s4165_s19  ;;  %2686 = vrot.lane.b32.xlu0 %v2685_v29, %s2977_s24  ;;  %v2415_v17 = vpop.f32.mrb[30].mxu0 }
 0x152   : > { %v836_v18 = vadd.f32 %v2415_v17, %v3250_v58  ;;  %v830_v19 = vpop.f32.mrb[31].mxu0 }
 0x153   : > { %v831_v20 = vadd.f32 %v3250_v58, %v830_v19  ;;  %v3482_v19 = vadd.f32 %v2412_v13, %v3250_v58 }
 0x154   : > { %v960_v21 = vmax.f32 %v836_v18, 0.0 }
 0x155   : > { %2696 = vrot.lane.b32.xlu1 %v2690_v12, %s2979_s25  ;;  %2701 = vrot.lane.b32.xlu0 %v2700_v16, %s4163_s17  ;;  %v959_v24 = vmax.f32 %v831_v20, 0.0  ;;  %v2418_v25 = vpop.f32.mrb[32].mxu0  ;;  %v3485_v20 = vadd.f32 %v3250_v58, %v820_v14  ;;  %v4147_v13 = vmax.f32 %v3482_v19, 0.0 }
 0x156   : > { %v846_v26 = vadd.f32 %v2418_v25, %v3250_v58  ;;  %v840_v28 = vpop.f32.mrb[33].mxu0 }
 0x157   : > { %v2780_v29 = vpack.i.bf16 %v960_v21, %v959_v24  ;;  %v841_v30 = vadd.f32 %v3250_v58, %v840_v28 }
 0x158   : > { %v962_v31 = vmax.f32 %v846_v26, 0.0 }
 0x159   : > { %2726 = vrot.lane.b32.xlu1 %v3444_v23, %s4163_s17  ;;  %2706 = vrot.lane.b32.xlu0 %v2700_v16, %s4165_s19  ;;  %v961_v33 = vmax.f32 %v841_v30, 0.0  ;;  %v2421_v36 = vpop.f32.mrb[34].mxu0  ;;  %v4150_v30 = vmax.f32 %v3485_v20, 0.0 }
 0x15a   : > { %v850_v38 = vpop.f32.mrb[35].mxu0 }
 0x15b   : > { %v3451_v39 = vpack.i.bf16 %v962_v31, %v961_v33 }
 0x15d   : > { %2731 = vrot.lane.b32.xlu1 %v3444_v23, %s4165_s19  ;;  %2711 = vrot.lane.b32.xlu0 %v2700_v16, %s2980_s30  ;;  %v2424_v48 = vpop.f32.mrb[36].mxu0 }
 0x15e   : > { %v860_v49 = vpop.f32.mrb[37].mxu0  ;;  %v866_v10 = vadd.f32 %v2424_v48, %v3250_v58 }
 0x15f   : > { %v861_v11 = vadd.f32 %v3250_v58, %v860_v49 }
 0x160   : > { %v3523_v52 = vmax.f32 %v866_v10, 0.0 }
 0x161   : > { %2736 = vrot.lane.b32.xlu1 %v3444_v23, %s2981_s15  ;;  %2716 = vrot.lane.b32.xlu0 %v2700_v16, %s2979_s25  ;;  %v3467_v8 = vpop.f32.mrb[38].mxu0 }
 0x162   : > { %v3469_v12 = vpop.f32.mrb[39].mxu0 }
 0x165   : > { %2741 = vrot.lane.b32.xlu1 %v3444_v23, %s2980_s30  ;;  %2721 = vrot.lane.b32.xlu0 %v2700_v16, %s2976_s22  ;;  %v2430_v9 = vpop.f32.mrb[40].mxu0 }
 0x166   : > { %v886_v17 = vadd.f32 %v2430_v9, %v3250_v58  ;;  %v880_v18 = vpop.f32.mrb[41].mxu0 }
 0x167   : > { %v881_v21 = vadd.f32 %v3250_v58, %v880_v18 }
 0x168   : > { %v970_v24 = vmax.f32 %v886_v17, 0.0 }
 0x169   : > { %2746 = vrot.lane.b32.xlu1 %v3444_v23, %s2979_s25  ;;  %2756 = vrot.lane.b32.xlu0 %v3478_v5, %s4163_s17  ;;  %v969_v16 = vmax.f32 %v881_v21, 0.0  ;;  %v2433_v25 = vpop.f32.mrb[42].mxu0  ;;  %v2770_v21 = vpack.i.bf16 %v4147_v13, %v4150_v30 }
 0x16a   : > { %v896_v26 = vadd.f32 %v2433_v25, %v3250_v58  ;;  %v890_v28 = vpop.f32.mrb[43].mxu0 }
 0x16b   : > { %v2840_v14 = vpack.i.bf16 %v970_v24, %v969_v16  ;;  %v891_v31 = vadd.f32 %v3250_v58, %v890_v28  ;;  %v3514_v28 = vadd.f32 %v3250_v58, %v850_v38 }
 0x16c   : > { %v972_v33 = vmax.f32 %v896_v26, 0.0  ;;  %v3511_v26 = vadd.f32 %v2421_v36, %v3250_v58  ;;  %v3525_v36 = vmax.f32 %v861_v11, 0.0 }
 0x16d   : > { %2751 = vrot.lane.b32.xlu1 %v3444_v23, %s2977_s24  ;;  %2761 = vrot.lane.b32.xlu0 %v3478_v5, %s2981_s15  ;;  %v971_v9 = vmax.f32 %v891_v31, 0.0  ;;  %v2436_v17 = vpop.f32.mrb[44].mxu0  ;;  %v4146_v22 = vmax.f32 %v3514_v28, 0.0 }
 0x16e   : > { %v900_v18 = vpop.f32.mrb[45].mxu0  ;;  %v4142_v31 = vmax.f32 %v3511_v26, 0.0  ;;  %v2825_v10 = vpack.i.bf16 %v3523_v52, %v3525_v36  ;;  %v906_v48 = vadd.f32 %v2436_v17, %v3250_v58 }
 0x16f   : > { %v2845_v25 = vpack.i.bf16 %v972_v33, %v971_v9  ;;  %v901_v11 = vadd.f32 %v3250_v58, %v900_v18 }
 0x171   : > { %2771 = vrot.lane.b32.xlu1 %v2770_v21, %s2981_s15  ;;  %2766 = vrot.lane.b32.xlu0 %v3478_v5, %s2980_s30  ;;  %v2439_v24 = vpop.f32.mrb[46].mxu0 }
 0x172   : > { %v910_v16 = vpop.f32.mrb[47].mxu0 }
 0x175   : > { %2786 = vrot.lane.b32.xlu1 %v3451_v39, %s4163_s17  ;;  %2776 = vrot.lane.b32.xlu0 %v2780_v29, %s4165_s19 }
 0x179   : > { %2791 = vrot.lane.b32.xlu1 %v3444_v23, %s2976_s22  ;;  %2781 = vrot.lane.b32.xlu0 %v2780_v29, %s2979_s25  ;;  %v2810_v23 = vpack.i.bf16 %v4142_v31, %v4146_v22  ;;  %v3548_v29 = vmax.f32 %v901_v11, 0.0  ;;  %v3587_v11 = vadd.f32 %v3250_v58, %v910_v16  ;;  %v681_v22 = vadd.f32 %v3250_v58, %v3245_v57 }
 0x17b   : > { %4172 = vst [vmem:[#allocation8_spill] sm:$0xff] %v3548_v29  ;;  %4176 = vst [vmem:[#allocation12_spill] sm:$0xff] %v3587_v11  ;;  %v4138_v59 = vmax.f32 %v3587_v11, 0.0  ;;  %v929_v50 = vmax.f32 %v681_v22, 0.0 }
 0x17d   : > { %2801 = vrot.lane.b32.xlu1 %v3451_v39, %s4165_s19  ;;  %2796 = vrot.lane.b32.xlu0 %v3478_v5, %s2977_s24 }
 0x181   : > { %2806 = vrot.lane.b32.xlu1 %v3451_v39, %s2980_s30  ;;  %2811 = vrot.lane.b32.xlu0 %v2810_v23, %s4163_s17 }
 0x185   : > { %2826 = vrot.lane.b32.xlu1 %v2825_v10, %s4163_s17  ;;  %2816 = vrot.lane.b32.xlu0 %v2810_v23, %s4165_s19 }
 0x189   : > { %2831 = vrot.lane.b32.xlu1 %v3451_v39, %s2979_s25  ;;  %2821 = vrot.lane.b32.xlu0 %v2810_v23, %s2981_s15  ;;  %v3558_v39 = vpop.f32.mrb[48].mxu0 }
 0x18a   : > { %4173 = vst [vmem:[#allocation9_spill] sm:$0xff] %v3558_v39  ;;  %v3561_v49 = vpop.f32.mrb[49].mxu0 }
 0x18b   : > { %4174 = vst [vmem:[#allocation10_spill] sm:$0xff] %v3561_v49 }
 0x18d   : > { %2841 = vrot.lane.b32.xlu1 %v2840_v14, %s4165_s19  ;;  %2836 = vrot.lane.b32.xlu0 %v2810_v23, %s2980_s30  ;;  %v3566_v14 = vmax.f32 %v906_v48, 0.0 }
 0x18f   : > { %4175 = vst [vmem:[#allocation11_spill] sm:$0xff] %v3566_v14 }
 0x191   : > { %1261 = vrot.lane.b32.xlu1 %v3525_v36, %s2981_s15  ;;  %2846 = vrot.lane.b32.xlu0 %v2845_v25, %s4163_s17 }
 0x193   : > { %v3553_v38 = vpop.permute.xlu0 %2586 }
 0x194   : > { %v2588_v6 = vunpack.i.l.bf16 %v3553_v38  ;;  %v2589_v54 = vunpack.i.h.bf16 %v3553_v38 }
 0x195   : > { %1377 = vrot.lane.b32.xlu1 %v3548_v29, %s4163_s17  ;;  %1321 = vrot.lane.b32.xlu0 %v971_v9, %s4165_s19  ;;  %v3578_v9 = vadd.f32 %v3250_v58, %v3469_v12  ;;  %v3599_v12 = vadd.f32 %v3467_v8, %v3250_v58 }
 0x196   : > { %v1404_v39 = vsel %vm1403_vm1, %v929_v50, %v2588_v6  ;;  %v4178_v6 = vmax.f32 %v3256_v62, 0.0 }
 0x197   : > { %v3568_v18 = vpop.permute.xlu1 %2596  ;;  %v3570_v25 = vpop.permute.xlu0 %2591 }
 0x198   : > { %v2593_v30 = vunpack.i.l.bf16 %v3570_v25  ;;  %v2598_v0 = vunpack.i.l.bf16 %v3568_v18  ;;  %v2594_v22 = vunpack.i.h.bf16 %v3570_v25  ;;  %v2599_v49 = vunpack.i.h.bf16 %v3568_v18 }
 0x199   : > { %1323 = vrot.lane.b32.xlu1 %v972_v33, %s4165_s19  ;;  %1263 = vrot.lane.b32.xlu0 %v3523_v52, %s2981_s15 }
 0x19a   : > { %v1422_v38 = vsel %vm463_vm0, %v1404_v39, %v2593_v30  ;;  %v1406_v50 = vsel %vm1403_vm1, %v4178_v6, %v2598_v0 }
 0x19b   : > { %v3582_v17 = vpop.permute.xlu0 %2601 }
 0x19c   : > { %v2604_v1 = vunpack.i.h.bf16 %v3582_v17 }
 0x19d   : > { %2851 = vrot.lane.b32.xlu1 %v3478_v5, %s2976_s22  ;;  %1379 = vrot.lane.b32.xlu0 %v3566_v14, %s4163_s17  ;;  %v4136_v5 = vmax.f32 %v3578_v9, 0.0 }
 0x19f   : > { %v3580_v33 = vpop.permute.xlu1 %2611 }
 0x1a1   : > { %2861 = vrot.lane.b32.xlu1 %v2810_v23, %s2979_s25  ;;  %2856 = vrot.lane.b32.xlu0 %v2770_v21, %s2977_s24  ;;  %v3601_v21 = vpop.permute.xlu0 %2606  ;;  %v3606_v23 = vadd.f32 %v2439_v24, %v3250_v58 }
 0x1a3   : > { %v3590_v48 = vpop.permute.xlu1 %2616  ;;  %4177 = vst [vmem:[#allocation13_spill] sm:$0xff] %v3606_v23  ;;  %v4148_v53 = vmax.f32 %v3606_v23, 0.0 }
 0x1a4   : > { %v2618_v63 = vunpack.i.l.bf16 %v3590_v48  ;;  %v2619_v11 = vunpack.i.h.bf16 %v3590_v48 }
 0x1a5   : > { %1265 = vrot.lane.b32.xlu1 %v4136_v5, %s2981_s15  ;;  %2866 = vrot.lane.b32.xlu0 %v2825_v10, %s2980_s30  ;;  %v4145_v10 = vmax.f32 %v3599_v12, 0.0 }
 0x1a6   : > { %v1441_v61 = vsel %vm1440_vm2, %v1422_v38, %v2618_v63 }
 0x1a7   : > { %v3603_v16 = vpop.permute.xlu1 %2621 }
 0x1a8   : > { %v2624_v25 = vunpack.i.h.bf16 %v3603_v16 }
 0x1a9   : > { %1381 = vrot.lane.b32.xlu1 %v4138_v59, %s4163_s17  ;;  %1325 = vrot.lane.b32.xlu0 %v3548_v29, %s4165_s19 }
 0x1ab   : > { %v3614_v5 = vpop.permute.xlu1 %2626  ;;  %v3616_v8 = vpop.permute.xlu0 %2636 }
 0x1ac   : > { %v2638_v3 = vunpack.i.l.bf16 %v3616_v8 }
 0x1ad   : > { %1327 = vrot.lane.b32.xlu1 %v3566_v14, %s4165_s19  ;;  %1267 = vrot.lane.b32.xlu0 %v4145_v10, %s2981_s15  ;;  %v686_v10 = vadd.f32 %v3243_v56, %v3250_v58  ;;  %v2623_v56 = vunpack.i.l.bf16 %v3603_v16  ;;  %v2603_v14 = vunpack.i.l.bf16 %v3582_v17 }
 0x1af   : > { %v3624_v24 = vpop.permute.xlu1 %2631  ;;  %v3626_v59 = vpop.permute.xlu0 %2641  ;;  %v930_v7 = vmax.f32 %v686_v10, 0.0  ;;  %v1460_v30 = vsel %vm1459_vm3, %v1441_v61, %v2623_v56 }
 0x1b0   : > { %v1479_v63 = vsel %vm1478_vm4, %v1460_v30, %v2638_v3  ;;  %v2643_v0 = vunpack.i.l.bf16 %v3626_v59 }
 0x1b1   : > { %1383 = vrot.lane.b32.xlu0 %v4148_v53, %s4163_s17  ;;  %v1405_v23 = vsel %vm1403_vm1, %v930_v7, %v2589_v54  ;;  %v2628_v7 = vunpack.i.l.bf16 %v3614_v5  ;;  %v2639_v54 = vunpack.i.h.bf16 %v3616_v8  ;;  %v1424_v8 = vsel %vm463_vm0, %v1406_v50, %v2603_v14 }
 0x1b2   : > { %v1423_v62 = vsel %vm463_vm0, %v1405_v23, %v2594_v22  ;;  %v2644_v14 = vunpack.i.h.bf16 %v3626_v59 }
 0x1b3   : > { %v3631_v55 = vpop.permute.xlu1 %2661  ;;  %v3633_v45 = vpop.permute.xlu0 %2646  ;;  %v1442_v16 = vsel %vm1440_vm2, %v1423_v62, %v2619_v11  ;;  %v1443_v22 = vsel %vm1440_vm2, %v1424_v8, %v2628_v7  ;;  %v4179_v11 = vmax.f32 %v3253_v60, 0.0 }
 0x1b4   : > { %v2663_v61 = vunpack.i.l.bf16 %v3631_v55  ;;  %v1461_v3 = vsel %vm1459_vm3, %v1442_v16, %v2624_v25  ;;  %v1462_v50 = vsel %vm1459_vm3, %v1443_v22, %v2643_v0  ;;  %v4180_v0 = vmax.f32 %v3460_v46, 0.0 }
 0x1b5   : > { %v1407_v17 = vsel %vm1403_vm1, %v4179_v11, %v2599_v49  ;;  %v4181_v46 = vmax.f32 %v3457_v43, 0.0  ;;  %v2648_v22 = vunpack.i.l.bf16 %v3633_v45 }
 0x1b6   : > { %v1425_v62 = vsel %vm463_vm0, %v1407_v17, %v2604_v1 }
 0x1b7   : > { %v3635_v44 = vpop.permute.xlu1 %2666  ;;  %v3637_v31 = vpop.permute.xlu0 %2651 }
 0x1bb   : > { %v3639_v34 = vpop.permute.xlu1 %2671  ;;  %v3641_v35 = vpop.permute.xlu0 %2656 }
 0x1bf   : > { %v3647_v13 = vpop.permute.xlu1 %2676  ;;  %v3649_v53 = vpop.permute.xlu0 %2681 }
 0x1c0   : > { %v2683_v43 = vunpack.i.l.bf16 %v3649_v53 }
 0x1c3   : > { %v2692_v57 = vpop.permute.xlu1 %2691  ;;  %v3657_v58 = vpop.permute.xlu0 %2686 }
 0x1c4   : > { %v2693_v10 = vunpack.i.l.bf16 %v2692_v57  ;;  %v2694_v48 = vunpack.i.h.bf16 %v2692_v57  ;;  %v2629_v57 = vunpack.i.h.bf16 %v3614_v5  ;;  %v2664_v5 = vunpack.i.h.bf16 %v3631_v55 }
 0x1c6   : > { %v1498_v38 = vsel %vm1497_vm5, %v1479_v63, %v2693_v10  ;;  %v1481_v63 = vsel %vm1478_vm4, %v1462_v50, %v2663_v61  ;;  %v1444_v49 = vsel %vm1440_vm2, %v1425_v62, %v2629_v57 }
 0x1c7   : > { %v3673_v39 = vpop.permute.xlu1 %2696  ;;  %v2702_v29 = vpop.permute.xlu0 %2701  ;;  %v1463_v55 = vsel %vm1459_vm3, %v1444_v49, %v2644_v14  ;;  %v4183_v14 = vmax.f32 %v3485_v20, 0.0 }
 0x1c8   : > { %v2703_v18 = vunpack.i.l.bf16 %v2702_v29  ;;  %v2704_v56 = vunpack.i.h.bf16 %v2702_v29  ;;  %v1480_v29 = vsel %vm1478_vm4, %v1461_v3, %v2639_v54  ;;  %v1482_v61 = vsel %vm1478_vm4, %v1463_v55, %v2664_v5 }
 0x1c9   : > { %v1499_v25 = vsel %vm1497_vm5, %v1480_v29, %v2694_v48  ;;  %v2608_v48 = vunpack.i.l.bf16 %v3601_v21  ;;  %v2613_v3 = vunpack.i.l.bf16 %v3580_v33  ;;  %v2668_v29 = vunpack.i.l.bf16 %v3635_v44 }
 0x1ca   : > { %v1517_v6 = vsel %vm1516_vm6, %v1498_v38, %v2703_v18  ;;  %v1518_v7 = vsel %vm1516_vm6, %v1499_v25, %v2704_v56  ;;  %v4184_v25 = vmax.f32 %v3261_v2, 0.0 }
 0x1cb   : > { %v2727_v30 = vpop.permute.xlu1 %2726  ;;  %v2707_v23 = vpop.permute.xlu0 %2706  ;;  %1663 = vmatmul.mubr.f32.vlgmr.msra.gmra.mrb[0].mxu1 %v1517_v6 }
 0x1cc   : > { %v2708_v10 = vunpack.i.l.bf16 %v2707_v23  ;;  %2276 = vmatprep.mubr.msk.f32.mxu1 %vm1403_vm1, %v3430_v15  ;;  %v2728_v18 = vunpack.i.l.bf16 %v2727_v30  ;;  %v2709_v54 = vunpack.i.h.bf16 %v2707_v23  ;;  %v2729_v16 = vunpack.i.h.bf16 %v2727_v30 }
 0x1cd   : > { %v2609_v23 = vunpack.i.h.bf16 %v3601_v21  ;;  %v4182_v30 = vmax.f32 %v3264_v4, 0.0  ;;  %v2614_v4 = vunpack.i.h.bf16 %v3580_v33  ;;  %v2684_v33 = vunpack.i.h.bf16 %v3649_v53 }
 0x1ce   : > { %v1500_v59 = vsel %vm1497_vm5, %v1481_v63, %v2708_v10  ;;  %v1501_v8 = vsel %vm1497_vm5, %v1482_v61, %v2709_v54  ;;  %v2669_v63 = vunpack.i.h.bf16 %v3635_v44  ;;  %v4185_v53 = vmax.f32 %v3482_v19, 0.0 }
 0x1cf   : > { %v2732_v38 = vpop.permute.xlu1 %2731  ;;  %v3702_v60 = vpop.permute.xlu0 %2711  ;;  %1668 = vmatmul.mubr.f32.gmra.mrb[2].mxu1 %v1518_v7  ;;  %v1519_v1 = vsel %vm1516_vm6, %v1500_v59, %v2728_v18  ;;  %v1408_v57 = vsel %vm1403_vm1, %v4182_v30, %v2608_v48  ;;  %v1520_v10 = vsel %vm1516_vm6, %v1501_v8, %v2729_v16  ;;  %v1409_v5 = vsel %vm1403_vm1, %v4184_v25, %v2609_v23 }
 0x1d0   : > { %2277 = vmatprep.mubr.msk.f32.mxu1 %vm1403_vm1, %v4180_v0  ;;  %v1426_v21 = vsel %vm463_vm0, %v1408_v57, %v2613_v3  ;;  %v2733_v50 = vunpack.i.l.bf16 %v2732_v38  ;;  %v2649_v18 = vunpack.i.h.bf16 %v3633_v45  ;;  %v1427_v2 = vsel %vm463_vm0, %v1409_v5, %v2614_v4 }
 0x1d1   : > { %v1445_v7 = vsel %vm1440_vm2, %v1426_v21, %v2648_v22  ;;  %v2734_v0 = vunpack.i.h.bf16 %v2732_v38  ;;  %v2633_v8 = vunpack.i.l.bf16 %v3624_v24  ;;  %v2634_v3 = vunpack.i.h.bf16 %v3624_v24 }
 0x1d2   : > { %v1464_v62 = vsel %vm1459_vm3, %v1445_v7, %v2668_v29  ;;  %v1446_v45 = vsel %vm1440_vm2, %v1427_v2, %v2649_v18  ;;  %v2653_v23 = vunpack.i.l.bf16 %v3637_v31  ;;  %v2654_v57 = vunpack.i.h.bf16 %v3637_v31 }
 0x1d3   : > { %v3713_v56 = vpop.permute.xlu1 %2736  ;;  %v3715_v6 = vpop.permute.xlu0 %2716  ;;  %1673 = vmatmul.mubr.f32.gmra.mrb[4].mxu1 %v1519_v1  ;;  %v1483_v49 = vsel %vm1478_vm4, %v1464_v62, %v2683_v43  ;;  %v1465_v16 = vsel %vm1459_vm3, %v1446_v45, %v2669_v63  ;;  %v2698_v22 = vunpack.i.l.bf16 %v3673_v39  ;;  %v2713_v29 = vunpack.i.l.bf16 %v3702_v60 }
 0x1d4   : > { %2278 = vmatprep.mubr.msk.f32.mxu1 %vm1403_vm1, %v4181_v46  ;;  %v1502_v55 = vsel %vm1497_vm5, %v1483_v49, %v2733_v50  ;;  %v1484_v38 = vsel %vm1478_vm4, %v1465_v16, %v2684_v33  ;;  %v4186_v43 = vmax.f32 %v3514_v28, 0.0  ;;  %v4187_v24 = vmax.f32 %v3303_v32, 0.0 }
 0x1d5   : > { %v1503_v46 = vsel %vm1497_vm5, %v1484_v38, %v2734_v0  ;;  %v2699_v4 = vunpack.i.h.bf16 %v3673_v39  ;;  %v2738_v31 = vunpack.i.l.bf16 %v3713_v56  ;;  %v4188_v21 = vmax.f32 %v3293_v27, 0.0 }
 0x1d6   : > { %v2714_v5 = vunpack.i.h.bf16 %v3702_v60  ;;  %v2739_v32 = vunpack.i.h.bf16 %v3713_v56  ;;  %v2659_v49 = vunpack.i.h.bf16 %v3641_v35  ;;  %v2658_v60 = vunpack.i.l.bf16 %v3641_v35 }
 0x1d7   : > { %v3729_v11 = vpop.permute.xlu1 %2741  ;;  %v3731_v17 = vpop.permute.xlu0 %2721  ;;  %1678 = vmatmul.mubr.f32.gmra.mrb[6].mxu1 %v1520_v10  ;;  %v1411_v50 = vsel %vm1403_vm1, %v4188_v21, %v2634_v3  ;;  %v2673_v35 = vunpack.i.l.bf16 %v3639_v34  ;;  %v4189_v38 = vmax.f32 %v3511_v26, 0.0  ;;  %v4191_v3 = vmax.f32 %v3323_v42, 0.0 }
 0x1d8   : > { %2279 = vmatprep.mubr.msk.f32.mxu1 %vm1403_vm1, %v4183_v14  ;;  %v1410_v14 = vsel %vm1403_vm1, %v4187_v24, %v2633_v8  ;;  %v1429_v28 = vsel %vm463_vm0, %v1411_v50, %v2654_v57  ;;  %v4190_v8 = vmax.f32 %v3310_v37, 0.0  ;;  %v2718_v57 = vunpack.i.l.bf16 %v3715_v6 }
 0x1d9   : > { %v1428_v25 = vsel %vm463_vm0, %v1410_v14, %v2653_v23  ;;  %v1448_v27 = vsel %vm1440_vm2, %v1429_v28, %v2699_v4  ;;  %v1412_v23 = vsel %vm1403_vm1, %v4191_v3, %v2658_v60  ;;  %v2719_v42 = vunpack.i.h.bf16 %v3715_v6 }
 0x1da   : > { %v1447_v18 = vsel %vm1440_vm2, %v1428_v25, %v2698_v22  ;;  %v1467_v2 = vsel %vm1459_vm3, %v1448_v27, %v2714_v5  ;;  %v2743_v22 = vunpack.i.l.bf16 %v3729_v11  ;;  %v1430_v24 = vsel %vm463_vm0, %v1412_v23, %v2673_v35 }
 0x1db   : > { %v3746_v20 = vpop.permute.xlu1 %2746  ;;  %v2757_v54 = vpop.permute.xlu0 %2756  ;;  %v1466_v39 = vsel %vm1459_vm3, %v1447_v18, %v2713_v29  ;;  %v4192_v21 = vmax.f32 %v3339_v51, 0.0  ;;  %v1449_v25 = vsel %vm1440_vm2, %v1430_v24, %v2718_v57  ;;  %v2689_v6 = vunpack.i.h.bf16 %v3657_v58 }
 0x1dc   : > { %v2758_v59 = vunpack.i.l.bf16 %v2757_v54  ;;  %v2759_v48 = vunpack.i.h.bf16 %v2757_v54  ;;  %v2748_v5 = vunpack.i.l.bf16 %v3746_v20  ;;  %v2744_v28 = vunpack.i.h.bf16 %v3729_v11 }
 0x1dd   : > { %v1468_v18 = vsel %vm1459_vm3, %v1449_v25, %v2743_v22  ;;  %v4193_v60 = vmax.f32 %v3330_v47, 0.0  ;;  %v2723_v22 = vunpack.i.l.bf16 %v3731_v17 }
 0x1de   : > { %v1521_v44 = vsel %vm1516_vm6, %v1502_v55, %v2758_v59  ;;  %v1522_v30 = vsel %vm1516_vm6, %v1503_v46, %v2759_v48  ;;  %v1485_v59 = vsel %vm1478_vm4, %v1466_v39, %v2738_v31  ;;  %v1413_v46 = vsel %vm1403_vm1, %v4190_v8, %v2659_v49 }
 0x1df   : > { %v3755_v1 = vpop.permute.xlu1 %2751  ;;  %v3757_v61 = vpop.permute.xlu0 %2761  ;;  %1683 = vmatmul.mubr.f32.gmra.mrb[8].mxu1 %v1521_v44  ;;  %v1486_v44 = vsel %vm1478_vm4, %v1467_v2, %v2739_v32  ;;  %v2679_v31 = vunpack.i.h.bf16 %v3647_v13 }
 0x1e0   : > { %2280 = vmatprep.mubr.msk.f32.mxu1 %vm1403_vm1, %v4185_v53  ;;  %v2674_v53 = vunpack.i.h.bf16 %v3639_v34  ;;  %v2763_v37 = vunpack.i.l.bf16 %v3757_v61  ;;  %v2764_v51 = vunpack.i.h.bf16 %v3757_v61 }
 0x1e1   : > { %v1415_v61 = vsel %vm1403_vm1, %v4193_v60, %v2679_v31 }
 0x1e2   : > { %v1431_v14 = vsel %vm463_vm0, %v1413_v46, %v2674_v53  ;;  %v1487_v39 = vsel %vm1478_vm4, %v1468_v18, %v2763_v37 }
 0x1e3   : > { %v3770_v10 = vpop.permute.xlu1 %2771  ;;  %v3772_v19 = vpop.permute.xlu0 %2766  ;;  %1688 = vmatmul.mubr.f32.gmra.mrb[10].mxu1 %v1522_v30  ;;  %v2678_v30 = vunpack.i.l.bf16 %v3647_v13 }
 0x1e4   : > { %2281 = vmatprep.mubr.msk.f32.mxu1 %vm1403_vm1, %v4186_v43  ;;  %v2688_v43 = vunpack.i.l.bf16 %v3657_v58  ;;  %v2768_v32 = vunpack.i.l.bf16 %v3772_v19  ;;  %v2749_v58 = vunpack.i.h.bf16 %v3746_v20  ;;  %v2773_v27 = vunpack.i.l.bf16 %v3770_v10 }
 0x1e5   : > { %v1414_v50 = vsel %vm1403_vm1, %v4192_v21, %v2678_v30 }
 0x1e6   : > { %v1432_v13 = vsel %vm463_vm0, %v1414_v50, %v2688_v43 }
 0x1e7   : > { %v2787_v7 = vpop.permute.xlu1 %2786  ;;  %v2777_v63 = vpop.permute.xlu0 %2776 }
 0x1e8   : > { %v2788_v62 = vunpack.i.l.bf16 %v2787_v7  ;;  %v2779_v54 = vunpack.i.h.bf16 %v2777_v63  ;;  %v2778_v33 = vunpack.i.l.bf16 %v2777_v63  ;;  %v2789_v56 = vunpack.i.h.bf16 %v2787_v7 }
 0x1ea   : > { %v1504_v0 = vsel %vm1497_vm5, %v1485_v59, %v2778_v33  ;;  %v1505_v16 = vsel %vm1497_vm5, %v1486_v44, %v2779_v54  ;;  %v1451_v33 = vsel %vm1440_vm2, %v1432_v13, %v2748_v5  ;;  %v1433_v44 = vsel %vm463_vm0, %v1415_v61, %v2689_v6 }
 0x1eb   : > { %v3798_v55 = vpop.permute.xlu1 %2791  ;;  %v3800_v45 = vpop.permute.xlu0 %2781  ;;  %v1523_v48 = vsel %vm1516_vm6, %v1504_v0, %v2788_v62  ;;  %v1524_v26 = vsel %vm1516_vm6, %v1505_v16, %v2789_v56  ;;  %v1450_v62 = vsel %vm1440_vm2, %v1431_v14, %v2719_v42  ;;  %v2769_v0 = vunpack.i.h.bf16 %v3772_v19 }
 0x1ec   : > { %1693 = vmatmul.mubr.f32.gmra.mrb[12].mxu1 %v1523_v48  ;;  %v1469_v2 = vsel %vm1459_vm3, %v1450_v62, %v2744_v28  ;;  %v1470_v20 = vsel %vm1459_vm3, %v1451_v33, %v2768_v32  ;;  %v1452_v47 = vsel %vm1440_vm2, %v1433_v44, %v2749_v58  ;;  %v2783_v43 = vunpack.i.l.bf16 %v3800_v45 }
 0x1ed   : > { %2282 = vmatprep.mubr.msk.f32.mxu1 %vm1403_vm1, %v4189_v38  ;;  %v1488_v53 = vsel %vm1478_vm4, %v1469_v2, %v2764_v51  ;;  %v2774_v38 = vunpack.i.h.bf16 %v3770_v10  ;;  %v1489_v46 = vsel %vm1478_vm4, %v1470_v20, %v2773_v27  ;;  %v1471_v3 = vsel %vm1459_vm3, %v1452_v47, %v2769_v0 }
 0x1ee   : > { %v2724_v10 = vunpack.i.h.bf16 %v3731_v17  ;;  %v2754_v14 = vunpack.i.h.bf16 %v3755_v1  ;;  %v4195_v17 = vmax.f32 %v3397_v41, 0.0  ;;  %v2793_v25 = vunpack.i.l.bf16 %v3798_v55 }
 0x1ef   : > { %v2802_v29 = vpop.permute.xlu1 %2801  ;;  %v3819_v34 = vpop.permute.xlu0 %2796  ;;  %v1490_v24 = vsel %vm1478_vm4, %v1471_v3, %v2774_v38  ;;  %v4196_v6 = vmax.f32 %v3599_v12, 0.0  ;;  %v2784_v41 = vunpack.i.h.bf16 %v3800_v45  ;;  %v2794_v61 = vunpack.i.h.bf16 %v3798_v55 }
 0x1f0   : > { %1698 = vmatmul.mubr.f32.gmra.mrb[14].mxu1 %v1524_v26  ;;  %v2803_v4 = vunpack.i.l.bf16 %v2802_v29  ;;  %v2804_v54 = vunpack.i.h.bf16 %v2802_v29  ;;  %v4194_v29 = vmax.f32 %v3578_v9, 0.0  ;;  %v2753_v26 = vunpack.i.l.bf16 %v3755_v1 }
 0x1f1   : > { %2283 = vmatprep.mubr.msk.f32.mxu1 %vm1403_vm1, %v3525_v36  ;;  %v1416_v50 = vsel %vm1403_vm1, %v4195_v17, %v2723_v22  ;;  %v4197_v1 = vmax.f32 %v3392_v40, 0.0  ;;  %v2798_v32 = vunpack.i.l.bf16 %v3819_v34 }
 0x1f2   : > { %v1506_v11 = vsel %vm1497_vm5, %v1487_v39, %v2803_v4  ;;  %v1507_v35 = vsel %vm1497_vm5, %v1488_v53, %v2804_v54  ;;  %v1434_v18 = vsel %vm463_vm0, %v1416_v50, %v2753_v26 }
 0x1f3   : > { %v3839_v7 = vpop.permute.xlu1 %2806  ;;  %v2812_v36 = vpop.permute.xlu0 %2811  ;;  %v1417_v28 = vsel %vm1403_vm1, %v4197_v1, %v2724_v10  ;;  %v1453_v13 = vsel %vm1440_vm2, %v1434_v18, %v2783_v43 }
 0x1f4   : > { %v2813_v63 = vunpack.i.l.bf16 %v2812_v36  ;;  %v2814_v59 = vunpack.i.h.bf16 %v2812_v36  ;;  %v2808_v4 = vunpack.i.l.bf16 %v3839_v7  ;;  %v1435_v12 = vsel %vm463_vm0, %v1417_v28, %v2754_v14  ;;  %v4206_v14 = vld [vmem:[#allocation10_spill] sm:$0xff] }
 0x1f5   : > { %v2809_v39 = vunpack.i.h.bf16 %v3839_v7  ;;  %v1454_v20 = vsel %vm1440_vm2, %v1435_v12, %v2784_v41 }
 0x1f6   : > { %v1525_v49 = vsel %vm1516_vm6, %v1506_v11, %v2813_v63  ;;  %v1526_v8 = vsel %vm1516_vm6, %v1507_v35, %v2814_v59  ;;  %v1472_v40 = vsel %vm1459_vm3, %v1453_v13, %v2808_v4  ;;  %v4198_v11 = vld [vmem:[#allocation6_spill] sm:$0xff]  ;;  %v4209_v13 = vld [vmem:[#allocation7_spill] sm:$0xff] }
 0x1f7   : > { %v2827_v56 = vpop.permute.xlu1 %2826  ;;  %v2817_v48 = vpop.permute.xlu0 %2816  ;;  %1703 = vmatmul.mubr.f32.gmra.mrb[16].mxu1 %v1525_v49  ;;  %v4199_v33 = vmax.f32 %v4198_v11, 0.0  ;;  %v4200_v49 = vld [vmem:[#allocation8_spill] sm:$0xff]  ;;  %v1473_v53 = vsel %vm1459_vm3, %v1454_v20, %v2809_v39 }
 0x1f8   : > { %v2818_v16 = vunpack.i.l.bf16 %v2817_v48  ;;  %2284 = vmatprep.mubr.msk.f32.mxu1 %vm1403_vm1, %v3523_v52  ;;  %v2828_v19 = vunpack.i.l.bf16 %v2827_v56  ;;  %v2819_v23 = vunpack.i.h.bf16 %v2817_v48  ;;  %v2829_v37 = vunpack.i.h.bf16 %v2827_v56 }
 0x1f9   : > { %v1418_v45 = vsel %vm1403_vm1, %v4199_v33, %v2793_v25  ;;  %v4207_v25 = vld [vmem:[#allocation13_spill] sm:$0xff] }
 0x1fa   : > { %v1508_v52 = vsel %vm1497_vm5, %v1489_v46, %v2818_v16  ;;  %v1509_v9 = vsel %vm1497_vm5, %v1490_v24, %v2819_v23  ;;  %v1436_v7 = vsel %vm463_vm0, %v1418_v45, %v2798_v32  ;;  %v2799_v16 = vunpack.i.h.bf16 %v3819_v34  ;;  %v4202_v23 = vld [vmem:[#allocation5_spill] sm:$0xff] }
 0x1fb   : > { %v3866_v30 = vpop.permute.xlu1 %2831  ;;  %v2822_v57 = vpop.permute.xlu0 %2821  ;;  %1708 = vmatmul.mubr.f32.gmra.mrb[18].mxu1 %v1526_v8  ;;  %v1527_v42 = vsel %vm1516_vm6, %v1508_v52, %v2828_v19  ;;  %v1528_v63 = vsel %vm1516_vm6, %v1509_v9, %v2829_v37  ;;  %v4201_v19 = vld [vmem:[#allocation11_spill] sm:$0xff]  ;;  %v4204_v37 = vld [vmem:[#allocation12_spill] sm:$0xff]  ;;  %v2890_v24 = vld [vmem:[%s4125_s5] ss:$0 sm:$0xff] }
 0x1fc   : > { %2285 = vmatprep.mubr.msk.f32.mxu1 %vm1403_vm1, %v4194_v29  ;;  %v2823_v5 = vunpack.i.l.bf16 %v2822_v57  ;;  %v2833_v51 = vunpack.i.l.bf16 %v3866_v30  ;;  %v2824_v27 = vunpack.i.h.bf16 %v2822_v57  ;;  %v2834_v38 = vunpack.i.h.bf16 %v3866_v30 }
 0x1fd   : > { %v4203_v57 = vmax.f32 %v4202_v23, 0.0  ;;  %v921_v4 = vadd.f32 %v2890_v24, %v4206_v14  ;;  %v1844_v23 = vld [vmem:[%s4123_s3 + $0x18] sm:$0xff] }
 0x1fe   : > { %v1491_v60 = vsel %vm1478_vm4, %v1472_v40, %v2823_v5  ;;  %v1455_v56 = vsel %vm1440_vm2, %v1436_v7, %v2833_v51  ;;  %v1492_v8 = vsel %vm1478_vm4, %v1473_v53, %v2824_v27  ;;  %v4208_v5 = vmax.f32 %v4207_v25, 0.0 }
 0x1ff   : > { %v2842_v31 = vpop.permute.xlu1 %2841  ;;  %v2837_v21 = vpop.permute.xlu0 %2836  ;;  %1713 = vmatmul.mubr.f32.gmra.mrb[20].mxu1 %v1527_v42  ;;  %v1419_v34 = vsel %vm1403_vm1, %v4203_v57, %v2794_v61  ;;  %v4205_v42 = vmax.f32 %v4204_v37, 0.0 }
 0x200   : > { %2286 = vmatprep.mubr.msk.f32.mxu1 %vm1403_vm1, %v4196_v6  ;;  %v2843_v36 = vunpack.i.l.bf16 %v2842_v31  ;;  %v2838_v62 = vunpack.i.l.bf16 %v2837_v21  ;;  %v2844_v2 = vunpack.i.h.bf16 %v2842_v31  ;;  %v2839_v46 = vunpack.i.h.bf16 %v2837_v21 }
 0x201   : > { %v1437_v29 = vsel %vm463_vm0, %v1419_v34, %v2799_v16  ;;  %v977_v6 = vmax.f32 %v921_v4, 0.0  ;;  %v4211_v34 = vmov 0.0|0.0   ;;  %v1849_v4 = vld [vmem:[%s4123_s3 + $0x40] sm:$0xff] }
 0x202   : > { %v1510_v0 = vsel %vm1497_vm5, %v1491_v60, %v2843_v36  ;;  %v1474_v47 = vsel %vm1459_vm3, %v1455_v56, %v2838_v62  ;;  %v1511_v3 = vsel %vm1497_vm5, %v1492_v8, %v2844_v2  ;;  %v1456_v43 = vsel %vm1440_vm2, %v1437_v29, %v2834_v38  ;;  %v4210_v62 = vld [vmem:[#allocation9_spill] sm:$0xff]  ;;  %v1842_v8 = vld [vmem:[%s4123_s3 + $0x8] sm:$0xff] }
 0x203   : > { %v1262_v58 = vpop.permute.xlu1 %1261  ;;  %v2847_v54 = vpop.permute.xlu0 %2846  ;;  %1718 = vmatmul.mubr.f32.gmra.mrb[22].mxu1 %v1528_v63  ;;  %v1475_v31 = vsel %vm1459_vm3, %v1456_v43, %v2839_v46  ;;  %v1843_v46 = vld [vmem:[%s4123_s3 + $0x10] sm:$0xff] }
 0x204   : > { %v2848_v59 = vunpack.i.l.bf16 %v2847_v54  ;;  %2287 = vmatprep.mubr.msk.f32.mxu1 %vm1403_vm1, %v4200_v49  ;;  %v2849_v48 = vunpack.i.h.bf16 %v2847_v54  ;;  %v1493_v52 = vsel %vm1478_vm4, %v1474_v47, %v1262_v58  ;;  %v926_v58 = vadd.f32 %v2890_v24, %v4210_v62 }
 0x205   : > { %v2489_v57 = vpack.c.bf16 %v1844_v23, %v1843_v46 }
 0x206   : > { %v1529_v44 = vsel %vm1516_vm6, %v1510_v0, %v2848_v59  ;;  %v1530_v22 = vsel %vm1516_vm6, %v1511_v3, %v2849_v48  ;;  %v978_v61 = vmax.f32 %v926_v58, 0.0 }
 0x207   : > { %v1378_v35 = vpop.permute.xlu1 %1377  ;;  %v1322_v55 = vpop.permute.xlu0 %1321  ;;  %1723 = vmatmul.mubr.f32.gmra.mrb[24].mxu1 %v1529_v44 }
 0x208   : > { %2288 = vmatprep.mubr.msk.f32.mxu1 %vm1403_vm1, %v4201_v19  ;;  %v1512_v30 = vsel %vm1497_vm5, %v1493_v52, %v1322_v55  ;;  %v1841_v19 = vld [vmem:[%s4123_s3] sm:$0xff] }
 0x209   : > { %v1531_v9 = vsel %vm1516_vm6, %v1512_v30, %v1378_v35  ;;  %v2486_v3 = vpack.c.bf16 %v1842_v8, %v1841_v19  ;;  %v1845_v52 = vld [vmem:[%s4123_s3 + $0x20] sm:$0xff]  ;;  %v1847_v30 = vld [vmem:[%s4123_s3 + $0x30] sm:$0xff] }
 0x20b   : > { %v1324_v10 = vpop.permute.xlu1 %1323  ;;  %v1264_v26 = vpop.permute.xlu0 %1263  ;;  %1728 = vmatmul.mubr.f32.gmra.mrb[26].mxu1 %v1530_v22  ;;  %2487 = vmatpush1.bf16.msra.mxu0 %v2486_v3  ;;  %v1846_v22 = vld [vmem:[%s4123_s3 + $0x28] sm:$0xff] }
 0x20c   : > { %2289 = vmatprep.mubr.msk.f32.mxu1 %vm1403_vm1, %v4205_v42  ;;  %v1494_v21 = vsel %vm1478_vm4, %v1475_v31, %v1264_v26  ;;  %2488 = vmatprep.subr.bf16.mxu0 %v4211_v34  ;;  %v2492_v29 = vpack.c.bf16 %v1846_v22, %v1845_v52  ;;  %v1850_v31 = vld [vmem:[%s4123_s3 + $0x48] sm:$0xff] }
 0x20d   : > { %v1513_v28 = vsel %vm1497_vm5, %v1494_v21, %v1324_v10  ;;  %v1848_v10 = vld [vmem:[%s4123_s3 + $0x38] sm:$0xff] }
 0x20e   : > { %v2495_v26 = vpack.c.bf16 %v1848_v10, %v1847_v30 }
 0x20f   : > { %v2852_v17 = vpop.permute.xlu1 %2851  ;;  %v1380_v50 = vpop.permute.xlu0 %1379  ;;  %1733 = vmatmul.mubr.f32.gmra.mrb[28].mxu1 %v1531_v9  ;;  %2490 = vmatpush1.bf16.msra.mxu0 %v2489_v57  ;;  %v2498_v9 = vpack.c.bf16 %v1850_v31, %v1849_v4 }
 0x210   : > { %2290 = vmatprep.mubr.msk.f32.mxu1 %vm1403_vm1, %v4208_v5  ;;  %v2853_v1 = vunpack.i.l.bf16 %v2852_v17  ;;  %v1532_v18 = vsel %vm1516_vm6, %v1513_v28, %v1380_v50  ;;  %v2854_v12 = vunpack.i.h.bf16 %v2852_v17  ;;  %2491 = vmatprep.subr.bf16.mxu0 %v4211_v34  ;;  %v4003_v17 = vld [vmem:[%s4126_s6] ss:$0 sm:$0xff] }
 0x212   : > { %v1420_v51 = vsel %vm1403_vm1, %v4209_v13, %v2853_v1  ;;  %v1421_v27 = vsel %vm1403_vm1, %v3430_v15, %v2854_v12  ;;  %v1853_v13 = vld [vmem:[%s4123_s3 + $0x60] sm:$0xff]  ;;  %v1854_v12 = vld [vmem:[%s4123_s3 + $0x68] sm:$0xff] }
 0x213   : > { %v2862_v32 = vpop.permute.xlu1 %2861  ;;  %v2857_v36 = vpop.permute.xlu0 %2856  ;;  %1738 = vmatmul.mubr.f32.gmra.mrb[30].mxu1 %v1532_v18  ;;  %2493 = vmatpush1.bf16.msra.mxu0 %v2492_v29 }
 0x214   : > { %v2858_v41 = vunpack.i.l.bf16 %v2857_v36  ;;  %2291 = vmatprep.mubr.msk.f32.mxu1 %vm1403_vm1, %v977_v6  ;;  %v2863_v63 = vunpack.i.l.bf16 %v2862_v32  ;;  %v2859_v40 = vunpack.i.h.bf16 %v2857_v36  ;;  %v2864_v59 = vunpack.i.h.bf16 %v2862_v32  ;;  %2494 = vmatprep.subr.bf16.mxu0 %v4211_v34  ;;  %v1851_v36 = vld [vmem:[%s4123_s3 + $0x50] sm:$0xff] }
 0x216   : > { %v1438_v39 = vsel %vm463_vm0, %v1420_v51, %v2858_v41  ;;  %v1439_v60 = vsel %vm463_vm0, %v1421_v27, %v2859_v40  ;;  %v1852_v41 = vld [vmem:[%s4123_s3 + $0x58] sm:$0xff]  ;;  %v2504_v40 = vpack.c.bf16 %v1854_v12, %v1853_v13  ;;  %v1855_v27 = vld [vmem:[%s4123_s3 + $0x70] sm:$0xff] }
 0x217   : > { %v1266_v54 = vpop.permute.xlu1 %1265  ;;  %v2867_v11 = vpop.permute.xlu0 %2866  ;;  %v1457_v45 = vsel %vm1440_vm2, %v1438_v39, %v2863_v63  ;;  %v1458_v44 = vsel %vm1440_vm2, %v1439_v60, %v2864_v59  ;;  %2496 = vmatpush1.bf16.msra.mxu0 %v2495_v26  ;;  %v2501_v63 = vpack.c.bf16 %v1852_v41, %v1851_v36  ;;  %v1856_v59 = vld [vmem:[%s4123_s3 + $0x78] sm:$0xff] }
 0x218   : > { %v2868_v33 = vunpack.i.l.bf16 %v2867_v11  ;;  %v2869_v7 = vunpack.i.h.bf16 %v2867_v11  ;;  %2497 = vmatprep.subr.bf16.mxu0 %v4211_v34 }
 0x21a   : > { %v1476_v49 = vsel %vm1459_vm3, %v1457_v45, %v2868_v33  ;;  %v1477_v15 = vsel %vm1459_vm3, %v1458_v44, %v2869_v7 }
 0x21b   : > { %v1382_v2 = vpop.permute.xlu1 %1381  ;;  %v1326_v0 = vpop.permute.xlu0 %1325  ;;  %v1495_v20 = vsel %vm1478_vm4, %v1476_v49, %v1266_v54  ;;  %2499 = vmatpush1.bf16.msra.mxu0 %v2498_v9  ;;  %v2507_v49 = vpack.c.bf16 %v1856_v59, %v1855_v27  ;;  %v1950_v9 = vld [vmem:[%s4124_s4 + $0x8] sm:$0xff] }
 0x21c   : > { %v1514_v56 = vsel %vm1497_vm5, %v1495_v20, %v1326_v0  ;;  %2500 = vmatprep.subr.bf16.mxu0 %v4211_v34 }
 0x21d   : > { %v1533_v48 = vsel %vm1516_vm6, %v1514_v56, %v1382_v2 }
 0x21e   : > { %1743 = vmatmul.mubr.f32.gmra.mrb[32].mxu1 %v1533_v48 }
 0x21f   : > { %v1268_v16 = vpop.permute.xlu0 %1267  ;;  %2292 = vmatprep.mubr.msk.f32.mxu1 %vm1403_vm1, %v978_v61  ;;  %v1328_v53 = vpop.permute.xlu1 %1327  ;;  %2502 = vmatpush1.bf16.msra.mxu0 %v2501_v63 }
 0x220   : > { %v1496_v47 = vsel %vm1478_vm4, %v1477_v15, %v1268_v16  ;;  %2503 = vmatprep.subr.bf16.mxu0 %v4211_v34 }
 0x221   : > { %v1515_v55 = vsel %vm1497_vm5, %v1496_v47, %v1328_v53  ;;  %v1857_v53 = vld [vmem:[%s4123_s3 + $0x80] sm:$0xff]  ;;  %v1858_v47 = vld [vmem:[%s4123_s3 + $0x88] sm:$0xff] }
 0x223   : > { %v1384_v35 = vpop.permute.xlu0 %1383  ;;  %2505 = vmatpush1.bf16.msra.mxu0 %v2504_v40 }
 0x224   : > { %v1534_v38 = vsel %vm1516_vm6, %v1515_v55, %v1384_v35  ;;  %2506 = vmatprep.subr.bf16.mxu0 %v4211_v34  ;;  %v2510_v35 = vpack.c.bf16 %v1858_v47, %v1857_v53 }
 0x225   : > { %1748 = vmatmul.mubr.f32.gmra.mrb[34].mxu1 %v1534_v38 }
 0x227   : > { %2508 = vmatpush1.bf16.msra.mxu0 %v2507_v49 }
 0x228   : > { %2509 = vmatprep.subr.bf16.mxu0 %v4211_v34 }
 0x22b   : > { %2511 = vmatpush1.bf16.msra.mxu0 %v2510_v35 }
 0x29e   : > { %v3990_v43 = vpop.f32.mrb[0].mxu1 }
 0x29f   : > { %v1666_v37 = vpop.f32.mrb[1].mxu1 }
 0x2a2   : > { %v3992_v42 = vpop.f32.mrb[2].mxu1 }
 0x2a3   : > { %v1671_v24 = vpop.f32.mrb[3].mxu1 }
 0x2a6   : > { %v1674_v14 = vpop.f32.mrb[4].mxu1 }
 0x2a7   : > { %v1676_v21 = vpop.f32.mrb[5].mxu1  ;;  %v1675_v50 = vadd.f32 %v4003_v17, %v1674_v14 }
 0x2a8   : > { %v1949_v21 = vld [vmem:[%s4124_s4] sm:$0xff] }
 0x2a9   : > { %v1755_v1 = vmax.f32 %v1675_v50, 0.0 }
 0x2aa   : > { %v1679_v25 = vpop.f32.mrb[6].mxu1 }
 0x2ab   : > { %v1680_v5 = vadd.f32 %v4003_v17, %v1679_v25  ;;  %v1681_v6 = vpop.f32.mrb[7].mxu1  ;;  %v2512_v25 = vpack.c.bf16 %v1950_v9, %v1949_v21 }
 0x2ad   : > { %v1756_v28 = vmax.f32 %v1680_v5, 0.0  ;;  %2513 = vmatprep.subr.bf16.mxu1 %v2512_v25 }
 0x2ae   : > { %2515 = vmatpush3.bf16.msra.mxu1 %v2512_v25  ;;  %v2296_v25 = vld [vmem:[%s4128_s8] ss:$0 sm:$0xff] }
 0x2af   : > { %v2870_v18 = vpack.i.bf16 %v1756_v28, %v1755_v1 }
 0x2b1   : > { %2871 = vrot.lane.b32.xlu1 %v2870_v18, %s2976_s22  ;;  %s4213_s22 = smov 112  }
 0x2b2   : > { %v1684_v32 = vpop.f32.mrb[8].mxu1 }
 0x2b3   : > { %v1686_v51 = vpop.f32.mrb[9].mxu1  ;;  %v1685_v39 = vadd.f32 %v4003_v17, %v1684_v32 }
 0x2b5   : > { %v1757_v11 = vmax.f32 %v1685_v39, 0.0 }
 0x2b6   : > { %v1689_v62 = vpop.f32.mrb[10].mxu1 }
 0x2b7   : > { %v1690_v58 = vadd.f32 %v4003_v17, %v1689_v62  ;;  %v1691_v54 = vpop.f32.mrb[11].mxu1 }
 0x2b9   : > { %v1758_v33 = vmax.f32 %v1690_v58, 0.0 }
 0x2bb   : > { %v2875_v45 = vpack.i.bf16 %v1758_v33, %v1757_v11  ;;  %v1665_v33 = vadd.f32 %v4003_v17, %v3990_v43 }
 0x2bd   : > { %2876 = vrot.lane.b32.xlu0 %v2875_v45, %s2977_s24  ;;  %s2301_s24 = sshll.u32 %s4222_s12, 5 }
 0x2be   : > { %s377_s21 = scalar_lea.vmem %s4129_s9, %s2301_s24 }
 0x2bf   : > { %v1694_v60 = vpop.f32.mrb[12].mxu1 }
 0x2c0   : > { %v1696_v61 = vpop.f32.mrb[13].mxu1  ;;  %v1695_v7 = vadd.f32 %v4003_v17, %v1694_v60  ;;  %v1753_v60 = vmax.f32 %v1665_v33, 0.0 }
 0x2c2   : > { %v1759_v56 = vmax.f32 %v1695_v7, 0.0 }
 0x2c3   : > { %v1699_v2 = vpop.f32.mrb[14].mxu1 }
 0x2c4   : > { %v1700_v0 = vadd.f32 %v4003_v17, %v1699_v2  ;;  %v1701_v20 = vpop.f32.mrb[15].mxu1 }
 0x2c6   : > { %v1760_v48 = vmax.f32 %v1700_v0, 0.0  ;;  %v1670_v0 = vadd.f32 %v4003_v17, %v3992_v42 }
 0x2c8   : > { %v2880_v44 = vpack.i.bf16 %v1760_v48, %v1759_v56  ;;  %v1754_v47 = vmax.f32 %v1670_v0, 0.0 }
 0x2ca   : > { %v1704_v16 = vpop.f32.mrb[16].mxu1  ;;  %2881 = vrot.lane.b32.xlu1 %v2880_v44, %s2979_s25  ;;  %s4212_s25 = smov 96  }
 0x2cb   : > { %v1706_v15 = vpop.f32.mrb[17].mxu1  ;;  %v1705_v55 = vadd.f32 %v4003_v17, %v1704_v16 }
 0x2cd   : > { %v1761_v46 = vmax.f32 %v1705_v55, 0.0 }
 0x2ce   : > { %v1709_v38 = vpop.f32.mrb[18].mxu1 }
 0x2cf   : > { %v1710_v19 = vadd.f32 %v4003_v17, %v1709_v38  ;;  %v1711_v8 = vpop.f32.mrb[19].mxu1 }
 0x2d1   : > { %v1762_v3 = vmax.f32 %v1710_v19, 0.0 }
 0x2d2   : > { %v1714_v23 = vpop.f32.mrb[20].mxu1 }
 0x2d3   : > { %v2885_v57 = vpack.i.bf16 %v1762_v3, %v1761_v46  ;;  %v1715_v34 = vadd.f32 %v4003_v17, %v1714_v23  ;;  %v1716_v52 = vpop.f32.mrb[21].mxu1 }
 0x2d5   : > { %v1763_v22 = vmax.f32 %v1715_v34, 0.0  ;;  %2886 = vrot.lane.b32.xlu0 %v2885_v57, %s2980_s30 }
 0x2d6   : > { %v1719_v29 = vpop.f32.mrb[22].mxu1 }
 0x2d7   : > { %v1721_v30 = vpop.f32.mrb[23].mxu1  ;;  %1805 = vrot.lane.b32.xlu1 %v1763_v22, %s2981_s15  ;;  %v1720_v24 = vadd.f32 %v4003_v17, %v1719_v29 }
 0x2d9   : > { %v1764_v50 = vmax.f32 %v1720_v24, 0.0 }
 0x2da   : > { %v1724_v10 = vpop.f32.mrb[24].mxu1 }
 0x2db   : > { %v1725_v26 = vadd.f32 %v4003_v17, %v1724_v10  ;;  %v1726_v37 = vpop.f32.mrb[25].mxu1 }
 0x2dd   : > { %v1765_v14 = vmax.f32 %v1725_v26, 0.0  ;;  %v2293_v26 = vld [vmem:[%s4127_s7] ss:$0 sm:$0xff] }
 0x2de   : > { %v1729_v4 = vpop.f32.mrb[26].mxu1 }
 0x2df   : > { %v1731_v31 = vpop.f32.mrb[27].mxu1  ;;  %1813 = vrot.lane.b32.xlu0 %v1765_v14, %s4212_s25  ;;  %v1730_v28 = vadd.f32 %v4003_v17, %v1729_v4 }
 0x2e1   : > { %v1766_v13 = vmax.f32 %v1730_v28, 0.0 }
 0x2e2   : > { %v1734_v5 = vpop.f32.mrb[28].mxu1 }
 0x2e3   : > { %v1735_v6 = vadd.f32 %v4003_v17, %v1734_v5  ;;  %v1736_v1 = vpop.f32.mrb[29].mxu1  ;;  %1807 = vrot.lane.b32.xlu0 %v1764_v50, %s2981_s15 }
 0x2e5   : > { %v1767_v18 = vmax.f32 %v1735_v6, 0.0 }
 0x2e6   : > { %v1739_v32 = vpop.f32.mrb[30].mxu1 }
 0x2e7   : > { %v1740_v36 = vadd.f32 %v4003_v17, %v1739_v32  ;;  %v1741_v41 = vpop.f32.mrb[31].mxu1  ;;  %1821 = vrot.lane.b32.xlu1 %v1767_v18, %s4213_s22 }
 0x2e9   : > { %v1768_v51 = vmax.f32 %v1740_v36, 0.0 }
 0x2eb   : > { %1823 = vrot.lane.b32.xlu0 %v1768_v51, %s4213_s22  ;;  %1815 = vrot.lane.b32.xlu1 %v1766_v13, %s4212_s25 }
 0x2f1   : > { %v1744_v63 = vpop.f32.mrb[32].mxu1 }
 0x2f2   : > { %v1745_v12 = vadd.f32 %v4003_v17, %v1744_v63  ;;  %v1746_v39 = vpop.f32.mrb[33].mxu1 }
 0x2f4   : > { %v1769_v40 = vmax.f32 %v1745_v12, 0.0 }
 0x2f6   : > { %2294 = vmatprep.mubr.msk.f32.mxu0 %vm1403_vm1, %v1769_v40 }
 0x2f8   : > { %v1749_v62 = vpop.f32.mrb[34].mxu1 }
 0x2f9   : > { %v1751_v58 = vpop.f32.mrb[35].mxu1  ;;  %v1750_v15 = vadd.f32 %v4003_v17, %v1749_v62 }
 0x2fb   : > { %v1770_v3 = vmax.f32 %v1750_v15, 0.0 }
 0x323   : > { %v2872_v54 = vpop.permute.xlu1 %2871 }
 0x324   : > { %v2873_v27 = vunpack.i.l.bf16 %v2872_v54  ;;  %v2874_v44 = vunpack.i.h.bf16 %v2872_v54 }
 0x326   : > { %v1827_v2 = vsel %vm1403_vm1, %v1753_v60, %v2873_v27  ;;  %v1828_v19 = vsel %vm1403_vm1, %v1754_v47, %v2874_v44 }
 0x32f   : > { %v2877_v11 = vpop.permute.xlu0 %2876 }
 0x330   : > { %v2878_v49 = vunpack.i.l.bf16 %v2877_v11  ;;  %v2879_v53 = vunpack.i.h.bf16 %v2877_v11 }
 0x332   : > { %v1829_v20 = vsel %vm463_vm0, %v1827_v2, %v2878_v49  ;;  %v1830_v23 = vsel %vm463_vm0, %v1828_v19, %v2879_v53 }
 0x33c   : > { %v2882_v45 = vpop.permute.xlu1 %2881 }
 0x33d   : > { %v2883_v61 = vunpack.i.l.bf16 %v2882_v45  ;;  %v2884_v35 = vunpack.i.h.bf16 %v2882_v45 }
 0x33f   : > { %v1831_v48 = vsel %vm1440_vm2, %v1829_v20, %v2883_v61  ;;  %v1832_v34 = vsel %vm1440_vm2, %v1830_v23, %v2884_v35 }
 0x347   : > { %v2887_v59 = vpop.permute.xlu0 %2886 }
 0x348   : > { %v2888_v7 = vunpack.i.l.bf16 %v2887_v59  ;;  %v2889_v55 = vunpack.i.h.bf16 %v2887_v59 }
 0x349   : > { %v1806_v16 = vpop.permute.xlu1 %1805 }
 0x34a   : > { %v1833_v43 = vsel %vm1459_vm3, %v1831_v48, %v2888_v7  ;;  %v1834_v17 = vsel %vm1459_vm3, %v1832_v34, %v2889_v55 }
 0x34b   : > { %v1835_v38 = vsel %vm1478_vm4, %v1833_v43, %v1806_v16 }
 0x351   : > { %v1814_v56 = vpop.permute.xlu0 %1813 }
 0x352   : > { %v1837_v42 = vsel %vm1497_vm5, %v1835_v38, %v1814_v56 }
 0x355   : > { %v1808_v8 = vpop.permute.xlu0 %1807 }
 0x356   : > { %v1836_v52 = vsel %vm1478_vm4, %v1834_v17, %v1808_v8 }
 0x359   : > { %v1822_v46 = vpop.permute.xlu1 %1821 }
 0x35a   : > { %v1839_v57 = vsel %vm1516_vm6, %v1837_v42, %v1822_v46 }
 0x35b   : > { %1937 = vmatmul.mubr.f32.vlgmr.msra.gmra.mrb[50].mxu0 %v1839_v57 }
 0x35c   : > { %2295 = vmatprep.mubr.msk.f32.mxu0 %vm1403_vm1, %v1770_v3 }
 0x35d   : > { %v1824_v22 = vpop.permute.xlu0 %1823  ;;  %v1816_v29 = vpop.permute.xlu1 %1815 }
 0x35e   : > { %v1838_v30 = vsel %vm1497_vm5, %v1836_v52, %v1816_v29 }
 0x35f   : > { %v1840_v10 = vsel %vm1516_vm6, %v1838_v30, %v1824_v22 }
 0x360   : > { %1942 = vmatmul.mubr.f32.gmra.mrb[52].mxu0 %v1840_v10 }
 0x42e   : > { %v1938_v37 = vpop.f32.mrb[50].mxu0 }
 0x42f   : > { %v1939_v24 = vadd.f32 %v2293_v26, %v1938_v37  ;;  %v1940_v14 = vpop.f32.mrb[51].mxu0 }
 0x431   : > { %v1947_v4 = vmax.f32 %v1939_v24, 0.0 }
 0x433   : > { %v1943_v31 = vpop.f32.mrb[52].mxu0  ;;  %2447 = vmatprep.mubr.msk.f32.mxu1 %vm1403_vm1, %v1947_v4 }
 0x434   : > { %v1944_v21 = vadd.f32 %v2293_v26, %v1943_v31  ;;  %v1945_v9 = vpop.f32.mrb[53].mxu0 }
 0x436   : > { %v1948_v50 = vmax.f32 %v1944_v21, 0.0 }
 0x438   : > { %2448 = vmatmul.mubr.msk.f32.vlgmr.msra.gmra.mrb[36].mxu1 %vm1403_vm1, %v1948_v50 }
 0x50b   : > { %v2449_v5 = vpop.f32.mrb[36].mxu1 }
 0x50c   : > { %v2030_v6 = vpop.f32.mrb[37].mxu1  ;;  %v2036_v28 = vadd.f32 %v2449_v5, %v2296_v25 }
 0x50d   : > { %v2031_v1 = vadd.f32 %v2296_v25, %v2030_v6 }
 0x50f   : > { %2039 = vxpose.xlu1.b32.start [1/2] (short) (narrow) %v2031_v1, 32 }
 0x513   : > { %2040 = vxpose.xlu1.b32.end [2/2] (short) (narrow) %v2036_v28, 32 }
 0x58f   : > { %v2055_v18 = vpop.trf.xlu1 }
 0x590   : > { %2071 = vst.msk [vmem:[%s377_s21] sm:$0xff] %vm1403_vm1, %v2055_v18 }
 0x593   : > { %v2056_v32 = vpop.trf.xlu1 }
 0x594   : > { %2072 = vst.msk [vmem:[%s377_s21 + $0x8] sm:$0xff] %vm1403_vm1, %v2056_v32 }
 0x597   : > { %v2057_v36 = vpop.trf.xlu1 }
 0x598   : > { %2073 = vst.msk [vmem:[%s377_s21 + $0x10] sm:$0xff] %vm1403_vm1, %v2057_v36 }
 0x59b   : > { %v2058_v41 = vpop.trf.xlu1 }
 0x59c   : > { %2074 = vst.msk [vmem:[%s377_s21 + $0x18] sm:$0xff] %vm1403_vm1, %v2058_v41 }
 0x59d PF: > { %s22_s14 = sadd.s32 1, %s2971_s14   ;;  %s4214_s30 = smov %s2955_s10 }
 0x59e   : > { %p19_p9 = scmp.ge.s32.totalorder %s22_s14, 4   ;;  %s4215_s10 = smov %s2959_s11 }
 0x59f   : > { %s4216_s11 = smov %s3079_s20  ;;  %s4217_s12 = smov %s2967_s13 }
 0x5a0   : > { %s4218_s13 = smov %s4220_s16  ;;  %21 = sbr.rel (!%p19_p9) target bundleno = 4 (0x4), region = 120 }
 0x5a7   :  { %2102 = vsyncpa [#allocation3], 1 }
 0x5a8   :  { %2104 = vsyncpa [#allocation3 + $0x1], 1 }

</bundles_post_ra>
